<compile_context>
chip_gen: v6e
topology: v6e:2x2x1
jax: 0.10.0
libtpu: 0.0.40
codegen_flags: <defaults>
</compile_context>

<pallas_src>
import functools

import jax
import jax.numpy as jnp
from jax.experimental import pallas as pl
from jax.experimental.pallas import tpu as pltpu


CFG = dict(
    vocab_size=64,
    d_model=32,
    num_heads=4,
    d_kv=8,
    d_ff=64,
    num_layers=2,
    rel_buckets=32,
    rel_max_distance=128,
)


# --------------------------- weight slab layout --------------------------------


def _slab_layout(cfg):
    D, dff, L = cfg["d_model"], cfg["d_ff"], cfg["num_layers"]
    entries = []
    for l in range(L):
        entries += [
            (f"ln1_{l}", 1, D),
            (f"ln2_{l}", 1, D),
            (f"wi_{l}", D, dff),
            (f"wo_ff_{l}", dff, D),
        ]
    entries += [
        ("final_ln", 1, D),
        ("head_w1", D, D),
        ("head_b1", 1, D),
        ("head_w2_t", 1, D),   # last Linear(D,1) weight stored transposed as a row
        ("head_b2", 1, 1),
    ]
    offsets, r = {}, 0
    for name, rows, cols in entries:
        offsets[name] = (r, rows, cols)
        r += rows
    return offsets, -(-r // 8) * 8      # pad total rows to a multiple of 8


SLAB_OFFSETS, SLAB_ROWS = _slab_layout(CFG)
SLAB_LANES = 128


# ------------------------------ fused Pallas kernel -----------------------------


def _t5_kernel(hidden_ref, pos_bias_ref, mask_ref, wqkv_ref, wo_ref, slab_ref,
               o_ref, *, S, D, H, dk, n_layers, offsets):
    f32 = jnp.float32

    def rd(name):                      # static-offset slab slice (one load per use)
        r, rows, cols = offsets[name]
        return slab_ref[r:r + rows, 0:cols]

    def rmsnorm(v, w):                 # T5 LayerNorm: no mean, no bias, eps=1e-6
        var = jnp.mean(v * v, axis=-1, keepdims=True)
        return v * jax.lax.rsqrt(var + 1e-6) * w

    x = hidden_ref[0]                              # (S, D)  this batch element
    pb = pos_bias_ref[...]                         # (H, S, S)   hoisted once
    em = (1.0 - mask_ref[...]) * (-1e9)            # (1, 1, S)   additive key mask

    for l in range(n_layers):
        # ---- self-attention block: RMSNorm -> head-batched QKV -> attn -> out-proj -> residual
        normed = rmsnorm(x, rd(f"ln1_{l}"))
        w3 = wqkv_ref[l]                                           # (3H, D, dk) head-major
        nb = jnp.broadcast_to(normed[None], (3 * H, S, D))
        qkv = jnp.einsum("psd,pdk->psk", nb, w3,
                         preferred_element_type=f32)               # (3H, S, dk)
        q, k, v = qkv[0:H], qkv[H:2 * H], qkv[2 * H:3 * H]         # (H, S, dk) each
        # T5 attention: q @ k^T + position_bias + additive mask; NO 1/sqrt(dk).
        s = jnp.einsum("hqd,hkd->hqk", q, k,
                       preferred_element_type=f32)                 # (H, S, S)
        s = s + pb + em
        m = jnp.max(s, axis=-1, keepdims=True)
        e = jnp.exp(s - m)
        p = e / jnp.sum(e, axis=-1, keepdims=True)                 # exact softmax
        ctx = jnp.einsum("hqk,hkd->hqd", p, v,
                         preferred_element_type=f32)               # (H, S, dk)
        # merge_heads + output projection fused: batched ctx @ wo[h], then sum heads
        proj = jnp.einsum("hsd,hdm->hsm", ctx, wo_ref[l],
                          preferred_element_type=f32)              # (H, S, D)
        x = x + jnp.sum(proj, axis=0)                              # residual

        # ---- feed-forward block: RMSNorm -> ReLU FFN -> residual
        normed = rmsnorm(x, rd(f"ln2_{l}"))
        h1 = jnp.maximum(
            jnp.dot(normed, rd(f"wi_{l}"), preferred_element_type=f32), 0.0)
        x = x + jnp.dot(h1, rd(f"wo_ff_{l}"), preferred_element_type=f32)

    x = rmsnorm(x, rd("final_ln"))                                 # final encoder LN

    # pooled = last_hidden_state[:, 0, :]; head: Linear -> ReLU -> Linear(D, 1)
    row = x[0:1, :]                                                # (1, D)  CLS@pos0
    hmid = jnp.maximum(
        jnp.dot(row, rd("head_w1"), preferred_element_type=f32) + rd("head_b1"), 0.0)
    out = jnp.sum(hmid * rd("head_w2_t"), axis=-1, keepdims=True) + rd("head_b2")
    o_ref[0] = out                                                 # (1, 1)


# ------------------------------ params & JAX glue -------------------------------


def init_params(key):
    c = CFG
    D, H, dk, dff, L = c["d_model"], c["num_heads"], c["d_kv"], c["d_ff"], c["num_layers"]
    keys = iter(jax.random.split(key, 64))

    def w(shape, scale=0.05):
        return (scale * jax.random.normal(next(keys), shape)).astype(jnp.float32)

    vals = {
        "final_ln": jnp.ones((1, D), jnp.float32),
        "head_w1": w((D, D)),
        "head_b1": jnp.zeros((1, D), jnp.float32),
        "head_w2_t": w((1, D)),
        "head_b2": jnp.zeros((1, 1), jnp.float32),
    }
    for l in range(L):
        vals[f"ln1_{l}"] = jnp.ones((1, D), jnp.float32)
        vals[f"ln2_{l}"] = jnp.ones((1, D), jnp.float32)
        vals[f"wi_{l}"] = w((D, dff))
        vals[f"wo_ff_{l}"] = w((dff, D))

    slab = jnp.zeros((SLAB_ROWS, SLAB_LANES), jnp.float32)
    for name, (r, rows, cols) in SLAB_OFFSETS.items():
        slab = slab.at[r:r + rows, 0:cols].set(vals[name].reshape(rows, cols))

    return {
        "embedding": w((c["vocab_size"], D), 1.0),
        "rel_bias": w((c["rel_buckets"], H), 0.1),
        "wqkv_all": w((L, 3 * H, D, dk)),     # head-major fused [q-heads | k-heads | v-heads]
        "wo_all": w((L, H, dk, D)),           # head-major output projection
        "slab": slab,                          # everything else, one DMA
    }


def _relative_position_bucket(rel_pos, num_buckets, max_distance):
    # Bidirectional (encoder) bucketing, mirrors HF T5.
    nb = num_buckets // 2
    buckets = (rel_pos > 0).astype(jnp.int32) * nb
    n = jnp.abs(rel_pos)
    max_exact = nb // 2
    is_small = n < max_exact
    val_if_large = max_exact + (
        jnp.log(jnp.maximum(n, 1).astype(jnp.float32) / max_exact)
        / jnp.log(max_distance / max_exact)
        * (nb - max_exact)
    ).astype(jnp.int32)
    val_if_large = jnp.minimum(val_if_large, nb - 1)
    return buckets + jnp.where(is_small, n, val_if_large)


def compute_position_bias(rel_bias_table, S):
    # TODO(synk): integer bucket math + table gather kept in plain JAX (tiny precompute).
    ctx = jnp.arange(S)[:, None]
    mem = jnp.arange(S)[None, :]
    buckets = _relative_position_bucket(
        mem - ctx, CFG["rel_buckets"], CFG["rel_max_distance"])    # (S, S)
    values = rel_bias_table[buckets]                               # (S, S, H)
    return jnp.transpose(values, (2, 0, 1))                        # (H, S, S)


@jax.jit
def t5_network_forward(params, input_ids, attention_mask):
    c = CFG
    B, S = input_ids.shape
    D, H, dk, L = c["d_model"], c["num_heads"], c["d_kv"], c["num_layers"]

    hidden = params["embedding"][input_ids].astype(jnp.float32)       # (B, S, D)
    pos_bias = compute_position_bias(params["rel_bias"], S)           # (H, S, S)
    mask3 = attention_mask.astype(jnp.float32).reshape(B, 1, S)       # (B, 1, S)

    kernel = functools.partial(
        _t5_kernel, S=S, D=D, H=H, dk=dk, n_layers=L, offsets=SLAB_OFFSETS)

    out = pl.pallas_call(
        kernel,
        out_shape=jax.ShapeDtypeStruct((B, 1, 1), jnp.float32),
        grid=(B,),
        in_specs=[
            pl.BlockSpec((1, S, D), lambda b: (b, 0, 0)),              # per-batch hidden
            pl.BlockSpec((H, S, S), lambda b: (0, 0, 0)),              # resident
            pl.BlockSpec((1, 1, S), lambda b: (b, 0, 0)),              # per-batch mask
            pl.BlockSpec((L, 3 * H, D, dk), lambda b: (0, 0, 0, 0)),   # resident
            pl.BlockSpec((L, H, dk, D), lambda b: (0, 0, 0, 0)),       # resident
            pl.BlockSpec((SLAB_ROWS, SLAB_LANES), lambda b: (0, 0)),   # resident
        ],
        out_specs=pl.BlockSpec((1, 1, 1), lambda b: (b, 0, 0)),
        compiler_params=pltpu.CompilerParams(
            dimension_semantics=("parallel",)),                        # v7x megacore
    )(hidden, pos_bias, mask3, params["wqkv_all"], params["wo_all"], params["slab"])
    return out.reshape(B, 1)


# ------------------------------ pure-JAX reference ------------------------------


def t5_forward_ref(params, input_ids, attention_mask):
    c = CFG
    D, H, dk, L = c["d_model"], c["num_heads"], c["d_kv"], c["num_layers"]
    hp = jax.lax.Precision.HIGHEST
    slab = params["slab"]

    def rd(name):
        r, rows, cols = SLAB_OFFSETS[name]
        return slab[r:r + rows, 0:cols]

    def rms(v, wt):
        return v * jax.lax.rsqrt(jnp.mean(v * v, -1, keepdims=True) + 1e-6) * wt

    x = params["embedding"][input_ids].astype(jnp.float32)            # (B, S, D)
    S = x.shape[1]
    pb = compute_position_bias(params["rel_bias"], S)
    em = (1.0 - attention_mask.astype(jnp.float32))[:, None, None, :] * (-1e9)

    for l in range(L):
        normed = rms(x, rd(f"ln1_{l}")[0])
        qkv = jnp.einsum("bsd,pdk->bpsk", normed, params["wqkv_all"][l], precision=hp)
        q, k, v = qkv[:, 0:H], qkv[:, H:2 * H], qkv[:, 2 * H:3 * H]
        s = jnp.einsum("bhqd,bhkd->bhqk", q, k, precision=hp) + pb[None] + em
        p = jax.nn.softmax(s, axis=-1)
        ctx = jnp.einsum("bhqk,bhkd->bhqd", p, v, precision=hp)
        x = x + jnp.einsum("bhsd,hdm->bsm", ctx, params["wo_all"][l], precision=hp)
        normed = rms(x, rd(f"ln2_{l}")[0])
        h1 = jnp.maximum(jnp.einsum("bsd,df->bsf", normed, rd(f"wi_{l}"), precision=hp), 0.0)
        x = x + jnp.einsum("bsf,fd->bsd", h1, rd(f"wo_ff_{l}"), precision=hp)

    x = rms(x, rd("final_ln")[0])
    pooled = x[:, 0, :]                                                # (B, D)
    hmid = jnp.maximum(jnp.dot(pooled, rd("head_w1"), precision=hp) + rd("head_b1")[0], 0.0)
    return jnp.sum(hmid * rd("head_w2_t")[0], -1, keepdims=True) + rd("head_b2")[0, 0]


# ------------------------------------- main --------------------------------------


if __name__ == "__main__":
    key = jax.random.PRNGKey(0)
    pkey, dkey = jax.random.split(key)

    params = init_params(pkey)

    B, S = 2, 8
    input_ids = jax.random.randint(dkey, (B, S), 0, CFG["vocab_size"], dtype=jnp.int32)
    attention_mask = jnp.ones((B, S), jnp.float32).at[1, -2:].set(0.0)  # pad tail of batch 1

    out = t5_network_forward(params, input_ids, attention_mask)
    out = jax.block_until_ready(out)

    assert out.shape == (B, 1), out.shape
    assert bool(jnp.all(jnp.isfinite(out)))

    ref = t5_forward_ref(params, input_ids, attention_mask)
    assert bool(jnp.allclose(out, ref, atol=2e-3, rtol=2e-3)), (out, ref)

    print("KERNEL_OK")
</pallas_src>

<mosaic_0001>
module attributes {stable_mosaic.version = 11 : i64} {
  func.func @_t5_kernel(%arg0: i32, %arg1: memref<1x8x32xf32, #tpu.memory_space<vmem>>, %arg2: memref<4x8x8xf32, #tpu.memory_space<vmem>>, %arg3: memref<1x1x8xf32, #tpu.memory_space<vmem>>, %arg4: memref<2x12x32x8xf32, #tpu.memory_space<vmem>>, %arg5: memref<2x4x8x32xf32, #tpu.memory_space<vmem>>, %arg6: memref<232x128xf32, #tpu.memory_space<vmem>>, %arg7: memref<1x1x1xf32, #tpu.memory_space<vmem>>) attributes {dimension_semantics = [#tpu.dimension_semantics<parallel>], iteration_bounds = array<i64: 2>, scalar_prefetch = 0 : i64, scratch_operands = 0 : i64, tpu.core_type = #tpu.core_type<tc>, window_params = [{transform_indices = @transform_0, window_bounds = array<i64: 1, 8, 32>}, {pipeline_mode = #tpu.pipeline_mode<synchronous>, transform_indices = @transform_1, window_bounds = array<i64: 4, 8, 8>}, {transform_indices = @transform_2, window_bounds = array<i64: 1, 1, 8>}, {pipeline_mode = #tpu.pipeline_mode<synchronous>, transform_indices = @transform_3, window_bounds = array<i64: 2, 12, 32, 8>}, {pipeline_mode = #tpu.pipeline_mode<synchronous>, transform_indices = @transform_4, window_bounds = array<i64: 2, 4, 8, 32>}, {pipeline_mode = #tpu.pipeline_mode<synchronous>, transform_indices = @transform_5, window_bounds = array<i64: 232, 128>}, {transform_indices = @transform_6, window_bounds = array<i64: 1, 1, 1>}]} {
    %c0 = arith.constant 0 : index
    %c0_0 = arith.constant 0 : index
    %c0_1 = arith.constant 0 : index
    %0 = vector.load %arg1[%c0, %c0_0, %c0_1] : memref<1x8x32xf32, #tpu.memory_space<vmem>>, vector<1x8x32xf32>
    %1 = vector.shape_cast %0 : vector<1x8x32xf32> to vector<8x32xf32>
    %c0_2 = arith.constant 0 : index
    %c0_3 = arith.constant 0 : index
    %c0_4 = arith.constant 0 : index
    %2 = vector.load %arg2[%c0_2, %c0_3, %c0_4] : memref<4x8x8xf32, #tpu.memory_space<vmem>>, vector<4x8x8xf32>
    %c0_5 = arith.constant 0 : index
    %c0_6 = arith.constant 0 : index
    %c0_7 = arith.constant 0 : index
    %3 = vector.load %arg3[%c0_5, %c0_6, %c0_7] : memref<1x1x8xf32, #tpu.memory_space<vmem>>, vector<1x1x8xf32>
    %cst = arith.constant 1.000000e+00 : f32
    %4 = vector.broadcast %cst : f32 to vector<1x1x8xf32>
    %5 = arith.subf %4, %3 : vector<1x1x8xf32>
    %cst_8 = arith.constant -1.000000e+09 : f32
    %6 = vector.broadcast %cst_8 : f32 to vector<1x1x8xf32>
    %7 = arith.mulf %5, %6 : vector<1x1x8xf32>
    %c0_9 = arith.constant 0 : index
    %c0_10 = arith.constant 0 : index
    %8 = vector.load %arg6[%c0_9, %c0_10] : memref<232x128xf32, #tpu.memory_space<vmem>>, vector<1x32xf32>
    %9 = arith.mulf %1, %1 : vector<8x32xf32>
    %cst_11 = arith.constant dense<0.000000e+00> : vector<8xf32>
    %10 = vector.multi_reduction <add>, %9, %cst_11 [1] : vector<8x32xf32> to vector<8xf32>
    %11 = vector.shape_cast %10 : vector<8xf32> to vector<8x1xf32>
    %cst_12 = arith.constant 3.200000e+01 : f32
    %12 = vector.broadcast %cst_12 : f32 to vector<8x1xf32>
    %13 = arith.divf %11, %12 : vector<8x1xf32>
    %cst_13 = arith.constant 9.99999997E-7 : f32
    %14 = vector.broadcast %cst_13 : f32 to vector<8x1xf32>
    %15 = arith.addf %13, %14 : vector<8x1xf32>
    %16 = math.rsqrt %15 : vector<8x1xf32>
    %17 = vector.broadcast %16 : vector<8x1xf32> to vector<8x32xf32>
    %18 = arith.mulf %1, %17 : vector<8x32xf32>
    %19 = vector.broadcast %8 : vector<1x32xf32> to vector<8x32xf32>
    %20 = arith.mulf %18, %19 : vector<8x32xf32>
    %c0_14 = arith.constant 0 : index
    %c0_15 = arith.constant 0 : index
    %c0_16 = arith.constant 0 : index
    %c0_17 = arith.constant 0 : index
    %21 = vector.load %arg4[%c0_14, %c0_15, %c0_16, %c0_17] : memref<2x12x32x8xf32, #tpu.memory_space<vmem>>, vector<1x12x32x8xf32>
    %22 = vector.shape_cast %21 : vector<1x12x32x8xf32> to vector<12x32x8xf32>
    %23 = vector.shape_cast %20 : vector<8x32xf32> to vector<1x8x32xf32>
    %24 = vector.shape_cast %23 : vector<1x8x32xf32> to vector<1x8x32xf32>
    %25 = vector.broadcast %24 : vector<1x8x32xf32> to vector<12x8x32xf32>
    "tpu.trace_start"() <{level = 10 : i32, message = "psd,pdk->psk"}> : () -> ()
    %cst_18 = arith.constant dense<0.000000e+00> : vector<12x8x8xf32>
    %26 = tpu.matmul %25, %22, %cst_18 {dimension_numbers = #tpu.dot_dimension_numbers<[2], [1], [1], [2], [0, 0, 0, 1, 1, 2], [0], [0]>} : vector<12x8x32xf32>, vector<12x32x8xf32>, vector<12x8x8xf32> -> vector<12x8x8xf32>
    "tpu.trace_stop"() : () -> ()
    %27 = vector.extract_strided_slice %26 {offsets = [0, 0, 0], sizes = [4, 8, 8], strides = [1, 1, 1]} : vector<12x8x8xf32> to vector<4x8x8xf32>
    %28 = vector.extract_strided_slice %26 {offsets = [4, 0, 0], sizes = [4, 8, 8], strides = [1, 1, 1]} : vector<12x8x8xf32> to vector<4x8x8xf32>
    %29 = vector.extract_strided_slice %26 {offsets = [8, 0, 0], sizes = [4, 8, 8], strides = [1, 1, 1]} : vector<12x8x8xf32> to vector<4x8x8xf32>
    "tpu.trace_start"() <{level = 10 : i32, message = "hqd,hkd->hqk"}> : () -> ()
    %cst_19 = arith.constant dense<0.000000e+00> : vector<4x8x8xf32>
    %30 = tpu.matmul %27, %28, %cst_19 {dimension_numbers = #tpu.dot_dimension_numbers<[2], [2], [1], [1], [0, 0, 0, 1, 1, 1], [0], [0]>} : vector<4x8x8xf32>, vector<4x8x8xf32>, vector<4x8x8xf32> -> vector<4x8x8xf32>
    "tpu.trace_stop"() : () -> ()
    %31 = arith.addf %30, %2 : vector<4x8x8xf32>
    %32 = vector.broadcast %7 : vector<1x1x8xf32> to vector<4x8x8xf32>
    %33 = arith.addf %31, %32 : vector<4x8x8xf32>
    %cst_20 = arith.constant dense<0xFF800000> : vector<4x8xf32>
    %34 = vector.multi_reduction <maximumf>, %33, %cst_20 [2] : vector<4x8x8xf32> to vector<4x8xf32>
    %35 = vector.shape_cast %34 : vector<4x8xf32> to vector<4x8x1xf32>
    %36 = vector.broadcast %35 : vector<4x8x1xf32> to vector<4x8x8xf32>
    %37 = arith.subf %33, %36 : vector<4x8x8xf32>
    %38 = math.exp %37 : vector<4x8x8xf32>
    %cst_21 = arith.constant dense<0.000000e+00> : vector<4x8xf32>
    %39 = vector.multi_reduction <add>, %38, %cst_21 [2] : vector<4x8x8xf32> to vector<4x8xf32>
    %40 = vector.shape_cast %39 : vector<4x8xf32> to vector<4x8x1xf32>
    %41 = vector.broadcast %40 : vector<4x8x1xf32> to vector<4x8x8xf32>
    %42 = arith.divf %38, %41 : vector<4x8x8xf32>
    "tpu.trace_start"() <{level = 10 : i32, message = "hqk,hkd->hqd"}> : () -> ()
    %cst_22 = arith.constant dense<0.000000e+00> : vector<4x8x8xf32>
    %43 = tpu.matmul %42, %29, %cst_22 {dimension_numbers = #tpu.dot_dimension_numbers<[2], [1], [1], [2], [0, 0, 0, 1, 1, 2], [0], [0]>} : vector<4x8x8xf32>, vector<4x8x8xf32>, vector<4x8x8xf32> -> vector<4x8x8xf32>
    "tpu.trace_stop"() : () -> ()
    %c0_23 = arith.constant 0 : index
    %c0_24 = arith.constant 0 : index
    %c0_25 = arith.constant 0 : index
    %c0_26 = arith.constant 0 : index
    %44 = vector.load %arg5[%c0_23, %c0_24, %c0_25, %c0_26] : memref<2x4x8x32xf32, #tpu.memory_space<vmem>>, vector<1x4x8x32xf32>
    %45 = vector.shape_cast %44 : vector<1x4x8x32xf32> to vector<4x8x32xf32>
    "tpu.trace_start"() <{level = 10 : i32, message = "hsd,hdm->hsm"}> : () -> ()
    %cst_27 = arith.constant dense<0.000000e+00> : vector<4x8x32xf32>
    %46 = tpu.matmul %43, %45, %cst_27 {dimension_numbers = #tpu.dot_dimension_numbers<[2], [1], [1], [2], [0, 0, 0, 1, 1, 2], [0], [0]>} : vector<4x8x8xf32>, vector<4x8x32xf32>, vector<4x8x32xf32> -> vector<4x8x32xf32>
    "tpu.trace_stop"() : () -> ()
    %cst_28 = arith.constant dense<0.000000e+00> : vector<8x32xf32>
    %47 = vector.multi_reduction <add>, %46, %cst_28 [0] : vector<4x8x32xf32> to vector<8x32xf32>
    %48 = arith.addf %1, %47 : vector<8x32xf32>
    %c1 = arith.constant 1 : index
    %c0_29 = arith.constant 0 : index
    %49 = vector.load %arg6[%c1, %c0_29] : memref<232x128xf32, #tpu.memory_space<vmem>>, vector<1x32xf32>
    %50 = arith.mulf %48, %48 : vector<8x32xf32>
    %cst_30 = arith.constant dense<0.000000e+00> : vector<8xf32>
    %51 = vector.multi_reduction <add>, %50, %cst_30 [1] : vector<8x32xf32> to vector<8xf32>
    %52 = vector.shape_cast %51 : vector<8xf32> to vector<8x1xf32>
    %cst_31 = arith.constant 3.200000e+01 : f32
    %53 = vector.broadcast %cst_31 : f32 to vector<8x1xf32>
    %54 = arith.divf %52, %53 : vector<8x1xf32>
    %cst_32 = arith.constant 9.99999997E-7 : f32
    %55 = vector.broadcast %cst_32 : f32 to vector<8x1xf32>
    %56 = arith.addf %54, %55 : vector<8x1xf32>
    %57 = math.rsqrt %56 : vector<8x1xf32>
    %58 = vector.broadcast %57 : vector<8x1xf32> to vector<8x32xf32>
    %59 = arith.mulf %48, %58 : vector<8x32xf32>
    %60 = vector.broadcast %49 : vector<1x32xf32> to vector<8x32xf32>
    %61 = arith.mulf %59, %60 : vector<8x32xf32>
    %c2 = arith.constant 2 : index
    %c0_33 = arith.constant 0 : index
    %62 = vector.load %arg6[%c2, %c0_33] : memref<232x128xf32, #tpu.memory_space<vmem>>, vector<32x64xf32>
    %cst_34 = arith.constant dense<0.000000e+00> : vector<8x64xf32>
    %63 = tpu.matmul %61, %62, %cst_34 {dimension_numbers = #tpu.dot_dimension_numbers<[1], [0], [0], [1], [0, 0, 1, 1], [], []>} : vector<8x32xf32>, vector<32x64xf32>, vector<8x64xf32> -> vector<8x64xf32>
    %cst_35 = arith.constant 0.000000e+00 : f32
    %64 = vector.broadcast %cst_35 : f32 to vector<8x64xf32>
    %65 = arith.maximumf %63, %64 : vector<8x64xf32>
    %c34 = arith.constant 34 : index
    %c0_36 = arith.constant 0 : index
    %66 = vector.load %arg6[%c34, %c0_36] : memref<232x128xf32, #tpu.memory_space<vmem>>, vector<64x32xf32>
    %cst_37 = arith.constant dense<0.000000e+00> : vector<8x32xf32>
    %67 = tpu.matmul %65, %66, %cst_37 {dimension_numbers = #tpu.dot_dimension_numbers<[1], [0], [0], [1], [0, 0, 1, 1], [], []>} : vector<8x64xf32>, vector<64x32xf32>, vector<8x32xf32> -> vector<8x32xf32>
    %68 = arith.addf %48, %67 : vector<8x32xf32>
    %c98 = arith.constant 98 : index
    %c0_38 = arith.constant 0 : index
    %69 = vector.load %arg6[%c98, %c0_38] : memref<232x128xf32, #tpu.memory_space<vmem>>, vector<1x32xf32>
    %70 = arith.mulf %68, %68 : vector<8x32xf32>
    %cst_39 = arith.constant dense<0.000000e+00> : vector<8xf32>
    %71 = vector.multi_reduction <add>, %70, %cst_39 [1] : vector<8x32xf32> to vector<8xf32>
    %72 = vector.shape_cast %71 : vector<8xf32> to vector<8x1xf32>
    %cst_40 = arith.constant 3.200000e+01 : f32
    %73 = vector.broadcast %cst_40 : f32 to vector<8x1xf32>
    %74 = arith.divf %72, %73 : vector<8x1xf32>
    %cst_41 = arith.constant 9.99999997E-7 : f32
    %75 = vector.broadcast %cst_41 : f32 to vector<8x1xf32>
    %76 = arith.addf %74, %75 : vector<8x1xf32>
    %77 = math.rsqrt %76 : vector<8x1xf32>
    %78 = vector.broadcast %77 : vector<8x1xf32> to vector<8x32xf32>
    %79 = arith.mulf %68, %78 : vector<8x32xf32>
    %80 = vector.broadcast %69 : vector<1x32xf32> to vector<8x32xf32>
    %81 = arith.mulf %79, %80 : vector<8x32xf32>
    %c1_42 = arith.constant 1 : index
    %c0_43 = arith.constant 0 : index
    %c0_44 = arith.constant 0 : index
    %c0_45 = arith.constant 0 : index
    %82 = vector.load %arg4[%c1_42, %c0_43, %c0_44, %c0_45] : memref<2x12x32x8xf32, #tpu.memory_space<vmem>>, vector<1x12x32x8xf32>
    %83 = vector.shape_cast %82 : vector<1x12x32x8xf32> to vector<12x32x8xf32>
    %84 = vector.shape_cast %81 : vector<8x32xf32> to vector<1x8x32xf32>
    %85 = vector.shape_cast %84 : vector<1x8x32xf32> to vector<1x8x32xf32>
    %86 = vector.broadcast %85 : vector<1x8x32xf32> to vector<12x8x32xf32>
    "tpu.trace_start"() <{level = 10 : i32, message = "psd,pdk->psk"}> : () -> ()
    %cst_46 = arith.constant dense<0.000000e+00> : vector<12x8x8xf32>
    %87 = tpu.matmul %86, %83, %cst_46 {dimension_numbers = #tpu.dot_dimension_numbers<[2], [1], [1], [2], [0, 0, 0, 1, 1, 2], [0], [0]>} : vector<12x8x32xf32>, vector<12x32x8xf32>, vector<12x8x8xf32> -> vector<12x8x8xf32>
    "tpu.trace_stop"() : () -> ()
    %88 = vector.extract_strided_slice %87 {offsets = [0, 0, 0], sizes = [4, 8, 8], strides = [1, 1, 1]} : vector<12x8x8xf32> to vector<4x8x8xf32>
    %89 = vector.extract_strided_slice %87 {offsets = [4, 0, 0], sizes = [4, 8, 8], strides = [1, 1, 1]} : vector<12x8x8xf32> to vector<4x8x8xf32>
    %90 = vector.extract_strided_slice %87 {offsets = [8, 0, 0], sizes = [4, 8, 8], strides = [1, 1, 1]} : vector<12x8x8xf32> to vector<4x8x8xf32>
    "tpu.trace_start"() <{level = 10 : i32, message = "hqd,hkd->hqk"}> : () -> ()
    %cst_47 = arith.constant dense<0.000000e+00> : vector<4x8x8xf32>
    %91 = tpu.matmul %88, %89, %cst_47 {dimension_numbers = #tpu.dot_dimension_numbers<[2], [2], [1], [1], [0, 0, 0, 1, 1, 1], [0], [0]>} : vector<4x8x8xf32>, vector<4x8x8xf32>, vector<4x8x8xf32> -> vector<4x8x8xf32>
    "tpu.trace_stop"() : () -> ()
    %92 = arith.addf %91, %2 : vector<4x8x8xf32>
    %93 = vector.broadcast %7 : vector<1x1x8xf32> to vector<4x8x8xf32>
    %94 = arith.addf %92, %93 : vector<4x8x8xf32>
    %cst_48 = arith.constant dense<0xFF800000> : vector<4x8xf32>
    %95 = vector.multi_reduction <maximumf>, %94, %cst_48 [2] : vector<4x8x8xf32> to vector<4x8xf32>
    %96 = vector.shape_cast %95 : vector<4x8xf32> to vector<4x8x1xf32>
    %97 = vector.broadcast %96 : vector<4x8x1xf32> to vector<4x8x8xf32>
    %98 = arith.subf %94, %97 : vector<4x8x8xf32>
    %99 = math.exp %98 : vector<4x8x8xf32>
    %cst_49 = arith.constant dense<0.000000e+00> : vector<4x8xf32>
    %100 = vector.multi_reduction <add>, %99, %cst_49 [2] : vector<4x8x8xf32> to vector<4x8xf32>
    %101 = vector.shape_cast %100 : vector<4x8xf32> to vector<4x8x1xf32>
    %102 = vector.broadcast %101 : vector<4x8x1xf32> to vector<4x8x8xf32>
    %103 = arith.divf %99, %102 : vector<4x8x8xf32>
    "tpu.trace_start"() <{level = 10 : i32, message = "hqk,hkd->hqd"}> : () -> ()
    %cst_50 = arith.constant dense<0.000000e+00> : vector<4x8x8xf32>
    %104 = tpu.matmul %103, %90, %cst_50 {dimension_numbers = #tpu.dot_dimension_numbers<[2], [1], [1], [2], [0, 0, 0, 1, 1, 2], [0], [0]>} : vector<4x8x8xf32>, vector<4x8x8xf32>, vector<4x8x8xf32> -> vector<4x8x8xf32>
    "tpu.trace_stop"() : () -> ()
    %c1_51 = arith.constant 1 : index
    %c0_52 = arith.constant 0 : index
    %c0_53 = arith.constant 0 : index
    %c0_54 = arith.constant 0 : index
    %105 = vector.load %arg5[%c1_51, %c0_52, %c0_53, %c0_54] : memref<2x4x8x32xf32, #tpu.memory_space<vmem>>, vector<1x4x8x32xf32>
    %106 = vector.shape_cast %105 : vector<1x4x8x32xf32> to vector<4x8x32xf32>
    "tpu.trace_start"() <{level = 10 : i32, message = "hsd,hdm->hsm"}> : () -> ()
    %cst_55 = arith.constant dense<0.000000e+00> : vector<4x8x32xf32>
    %107 = tpu.matmul %104, %106, %cst_55 {dimension_numbers = #tpu.dot_dimension_numbers<[2], [1], [1], [2], [0, 0, 0, 1, 1, 2], [0], [0]>} : vector<4x8x8xf32>, vector<4x8x32xf32>, vector<4x8x32xf32> -> vector<4x8x32xf32>
    "tpu.trace_stop"() : () -> ()
    %cst_56 = arith.constant dense<0.000000e+00> : vector<8x32xf32>
    %108 = vector.multi_reduction <add>, %107, %cst_56 [0] : vector<4x8x32xf32> to vector<8x32xf32>
    %109 = arith.addf %68, %108 : vector<8x32xf32>
    %c99 = arith.constant 99 : index
    %c0_57 = arith.constant 0 : index
    %110 = vector.load %arg6[%c99, %c0_57] : memref<232x128xf32, #tpu.memory_space<vmem>>, vector<1x32xf32>
    %111 = arith.mulf %109, %109 : vector<8x32xf32>
    %cst_58 = arith.constant dense<0.000000e+00> : vector<8xf32>
    %112 = vector.multi_reduction <add>, %111, %cst_58 [1] : vector<8x32xf32> to vector<8xf32>
    %113 = vector.shape_cast %112 : vector<8xf32> to vector<8x1xf32>
    %cst_59 = arith.constant 3.200000e+01 : f32
    %114 = vector.broadcast %cst_59 : f32 to vector<8x1xf32>
    %115 = arith.divf %113, %114 : vector<8x1xf32>
    %cst_60 = arith.constant 9.99999997E-7 : f32
    %116 = vector.broadcast %cst_60 : f32 to vector<8x1xf32>
    %117 = arith.addf %115, %116 : vector<8x1xf32>
    %118 = math.rsqrt %117 : vector<8x1xf32>
    %119 = vector.broadcast %118 : vector<8x1xf32> to vector<8x32xf32>
    %120 = arith.mulf %109, %119 : vector<8x32xf32>
    %121 = vector.broadcast %110 : vector<1x32xf32> to vector<8x32xf32>
    %122 = arith.mulf %120, %121 : vector<8x32xf32>
    %c100 = arith.constant 100 : index
    %c0_61 = arith.constant 0 : index
    %123 = vector.load %arg6[%c100, %c0_61] : memref<232x128xf32, #tpu.memory_space<vmem>>, vector<32x64xf32>
    %cst_62 = arith.constant dense<0.000000e+00> : vector<8x64xf32>
    %124 = tpu.matmul %122, %123, %cst_62 {dimension_numbers = #tpu.dot_dimension_numbers<[1], [0], [0], [1], [0, 0, 1, 1], [], []>} : vector<8x32xf32>, vector<32x64xf32>, vector<8x64xf32> -> vector<8x64xf32>
    %cst_63 = arith.constant 0.000000e+00 : f32
    %125 = vector.broadcast %cst_63 : f32 to vector<8x64xf32>
    %126 = arith.maximumf %124, %125 : vector<8x64xf32>
    %c132 = arith.constant 132 : index
    %c0_64 = arith.constant 0 : index
    %127 = vector.load %arg6[%c132, %c0_64] : memref<232x128xf32, #tpu.memory_space<vmem>>, vector<64x32xf32>
    %cst_65 = arith.constant dense<0.000000e+00> : vector<8x32xf32>
    %128 = tpu.matmul %126, %127, %cst_65 {dimension_numbers = #tpu.dot_dimension_numbers<[1], [0], [0], [1], [0, 0, 1, 1], [], []>} : vector<8x64xf32>, vector<64x32xf32>, vector<8x32xf32> -> vector<8x32xf32>
    %129 = arith.addf %109, %128 : vector<8x32xf32>
    %c196 = arith.constant 196 : index
    %c0_66 = arith.constant 0 : index
    %130 = vector.load %arg6[%c196, %c0_66] : memref<232x128xf32, #tpu.memory_space<vmem>>, vector<1x32xf32>
    %131 = arith.mulf %129, %129 : vector<8x32xf32>
    %cst_67 = arith.constant dense<0.000000e+00> : vector<8xf32>
    %132 = vector.multi_reduction <add>, %131, %cst_67 [1] : vector<8x32xf32> to vector<8xf32>
    %133 = vector.shape_cast %132 : vector<8xf32> to vector<8x1xf32>
    %cst_68 = arith.constant 3.200000e+01 : f32
    %134 = vector.broadcast %cst_68 : f32 to vector<8x1xf32>
    %135 = arith.divf %133, %134 : vector<8x1xf32>
    %cst_69 = arith.constant 9.99999997E-7 : f32
    %136 = vector.broadcast %cst_69 : f32 to vector<8x1xf32>
    %137 = arith.addf %135, %136 : vector<8x1xf32>
    %138 = math.rsqrt %137 : vector<8x1xf32>
    %139 = vector.broadcast %138 : vector<8x1xf32> to vector<8x32xf32>
    %140 = arith.mulf %129, %139 : vector<8x32xf32>
    %141 = vector.broadcast %130 : vector<1x32xf32> to vector<8x32xf32>
    %142 = arith.mulf %140, %141 : vector<8x32xf32>
    %143 = vector.extract_strided_slice %142 {offsets = [0, 0], sizes = [1, 32], strides = [1, 1]} : vector<8x32xf32> to vector<1x32xf32>
    %c197 = arith.constant 197 : index
    %c0_70 = arith.constant 0 : index
    %144 = vector.load %arg6[%c197, %c0_70] : memref<232x128xf32, #tpu.memory_space<vmem>>, vector<32x32xf32>
    %cst_71 = arith.constant dense<0.000000e+00> : vector<1x32xf32>
    %145 = tpu.matmul %143, %144, %cst_71 {dimension_numbers = #tpu.dot_dimension_numbers<[1], [0], [0], [1], [0, 0, 1, 1], [], []>} : vector<1x32xf32>, vector<32x32xf32>, vector<1x32xf32> -> vector<1x32xf32>
    %c229 = arith.constant 229 : index
    %c0_72 = arith.constant 0 : index
    %146 = vector.load %arg6[%c229, %c0_72] : memref<232x128xf32, #tpu.memory_space<vmem>>, vector<1x32xf32>
    %147 = arith.addf %145, %146 : vector<1x32xf32>
    %cst_73 = arith.constant 0.000000e+00 : f32
    %148 = vector.broadcast %cst_73 : f32 to vector<1x32xf32>
    %149 = arith.maximumf %147, %148 : vector<1x32xf32>
    %c230 = arith.constant 230 : index
    %c0_74 = arith.constant 0 : index
    %150 = vector.load %arg6[%c230, %c0_74] : memref<232x128xf32, #tpu.memory_space<vmem>>, vector<1x32xf32>
    %151 = arith.mulf %149, %150 : vector<1x32xf32>
    %cst_75 = arith.constant dense<0.000000e+00> : vector<1xf32>
    %152 = vector.multi_reduction <add>, %151, %cst_75 [1] : vector<1x32xf32> to vector<1xf32>
    %153 = vector.shape_cast %152 : vector<1xf32> to vector<1x1xf32>
    %c231 = arith.constant 231 : index
    %c0_76 = arith.constant 0 : index
    %154 = vector.load %arg6[%c231, %c0_76] : memref<232x128xf32, #tpu.memory_space<vmem>>, vector<1x1xf32>
    %155 = arith.addf %153, %154 : vector<1x1xf32>
    %c0_77 = arith.constant 0 : index
    %c0_78 = arith.constant 0 : index
    %c0_79 = arith.constant 0 : index
    %156 = vector.load %arg7[%c0_77, %c0_78, %c0_79] : memref<1x1x1xf32, #tpu.memory_space<vmem>>, vector<1x1x1xf32>
    %157 = vector.shape_cast %156 : vector<1x1x1xf32> to vector<1x1xf32>
    %158 = vector.shape_cast %155 : vector<1x1xf32> to vector<1x1x1xf32>
    tpu.vector_store %arg7[%c0_77, %c0_78, %c0_79], %158 {strides = array<i32>} : memref<1x1x1xf32, #tpu.memory_space<vmem>>, vector<1x1x1xf32>,
    return
  }
  func.func @transform_0(%arg0: i32) -> (i32, i32, i32) {
    %c0_i32 = arith.constant 0 : i32
    %c0_i32_0 = arith.constant 0 : i32
    %c0_i32_1 = arith.constant 0 : i32
    return %arg0, %c0_i32, %c0_i32_0 : i32, i32, i32
  }
  func.func @transform_1(%arg0: i32) -> (i32, i32, i32) {
    %c0_i32 = arith.constant 0 : i32
    %c0_i32_0 = arith.constant 0 : i32
    %c0_i32_1 = arith.constant 0 : i32
    %c0_i32_2 = arith.constant 0 : i32
    return %c0_i32, %c0_i32_0, %c0_i32_1 : i32, i32, i32
  }
  func.func @transform_2(%arg0: i32) -> (i32, i32, i32) {
    %c0_i32 = arith.constant 0 : i32
    %c0_i32_0 = arith.constant 0 : i32
    %c0_i32_1 = arith.constant 0 : i32
    return %arg0, %c0_i32, %c0_i32_0 : i32, i32, i32
  }
  func.func @transform_3(%arg0: i32) -> (i32, i32, i32, i32) {
    %c0_i32 = arith.constant 0 : i32
    %c0_i32_0 = arith.constant 0 : i32
    %c0_i32_1 = arith.constant 0 : i32
    %c0_i32_2 = arith.constant 0 : i32
    %c0_i32_3 = arith.constant 0 : i32
    return %c0_i32, %c0_i32_0, %c0_i32_1, %c0_i32_2 : i32, i32, i32, i32
  }
  func.func @transform_4(%arg0: i32) -> (i32, i32, i32, i32) {
    %c0_i32 = arith.constant 0 : i32
    %c0_i32_0 = arith.constant 0 : i32
    %c0_i32_1 = arith.constant 0 : i32
    %c0_i32_2 = arith.constant 0 : i32
    %c0_i32_3 = arith.constant 0 : i32
    return %c0_i32, %c0_i32_0, %c0_i32_1, %c0_i32_2 : i32, i32, i32, i32
  }
  func.func @transform_5(%arg0: i32) -> (i32, i32) {
    %c0_i32 = arith.constant 0 : i32
    %c0_i32_0 = arith.constant 0 : i32
    %c0_i32_1 = arith.constant 0 : i32
    return %c0_i32, %c0_i32_0 : i32, i32
  }
  func.func @transform_6(%arg0: i32) -> (i32, i32, i32) {
    %c0_i32 = arith.constant 0 : i32
    %c0_i32_0 = arith.constant 0 : i32
    %c0_i32_1 = arith.constant 0 : i32
    return %arg0, %c0_i32, %c0_i32_0 : i32, i32, i32
  }
}

</mosaic_0001>

<bundles_post_ra>
// kernel: t5_network_forward.1
= control target key start
LH: loop header
LB: loop body
LE: loop exit
PB: predicated region body
PF: predicated region fallthrough
CT: control target
= control target key end

     0   :  { %s5371_s21 = smov 0   ;;  %s6250_s0 = inlined_call_operand.vmem [shape: f32[2,8,32], index: 0, kind: input, shape index: {}]   ;;  %s6251_s1 = inlined_call_operand.vmem [shape: f32[4,8,8], index: 1, kind: input, shape index: {}]   ;;  %s6252_s2 = inlined_call_operand.vmem [shape: f32[2,1,8], index: 2, kind: input, shape index: {}]   ;;  %s6253_s3 = inlined_call_operand.vmem [shape: f32[2,12,32,8], index: 3, kind: input, shape index: {}]   ;;  %s6254_s4 = inlined_call_operand.vmem [shape: f32[2,4,8,32], index: 4, kind: input, shape index: {}]   ;;  %s6255_s5 = inlined_call_operand.vmem [shape: f32[232,128], index: 5, kind: input, shape index: {}]   ;;  %s6256_s6 = inlined_call_operand.vmem [shape: f32[2,1,1], index: 6, kind: output, shape index: {}]  }
   0x1 LB: > { %s4492_s22 = sadd.s32 4294967295, %s5332_s21   ;;  %p4496_p0 = scmp.ge.s32.totalorder %s5332_s21, 1  ;;  %s5332_s21 = sphi %s5371_s21, %s16_s21  }
   0x2   : > { %p219_p1 = scmp.lt.s32.totalorder %s5332_s21, 3 }
   0x4   : > { %p220_p2 = pnand %p4496_p0, %p219_p1 }
   0x5   : > { %p249_p3 = scmp.lt.s32.totalorder (!%p220_p2), %s4492_s22, 1 }
   0x6   : > { %223 = sbr.rel (%p220_p2) target bundleno = 4214 (0x1076), region = 44 }
   0xb   : > { %s6258_s22 = smov (!%p249_p3, %s4492_s22), 1  ;;  %vm269_vm0 = vcmask 261120   ;;  %v5334_v3 = vmov 0.0   ;;  %v286_v4 = vld [vmem:[%s6253_s3 + $0x18] sm:$0xff]  ;;  %v285_v6 = vld [vmem:[%s6253_s3 + $0x10] sm:$0xff]  ;;  %v284_v8 = vld [vmem:[%s6253_s3 + $0x8] sm:$0xff] }
   0xc   : > { %s4497_s23 = sshll.u32 %s6258_s22, 3  ;;  %4819 = vmatprep.subr.mxu0 %v5334_v3  ;;  %4830 = vmatprep.subr.mxu1 %v5334_v3  ;;  %v290_v5 = vld [vmem:[%s6253_s3 + $0x38] sm:$0xff]  ;;  %v289_v7 = vld [vmem:[%s6253_s3 + $0x30] sm:$0xff]  ;;  %v288_v9 = vld [vmem:[%s6253_s3 + $0x28] sm:$0xff]  ;;  %vm5335_vm1 = vmmov 0   ;;  %vm1174_vm2 = vcmask 64512   ;;  %s255_s15 = scalar_lea.vmem %s6252_s2, %s6258_s22 }
   0xd   : > { %s252_s26 = scalar_lea.vmem %s6250_s0, %s4497_s23  ;;  %4820 = vmatpush3.msra.mxu0 %v286_v4  ;;  %4831 = vmatpush3.msra.mxu1 %v290_v5  ;;  %v283_v10 = vld [vmem:[%s6253_s3] sm:$0xff]  ;;  %v294_v19 = vld [vmem:[%s6253_s3 + $0x58] sm:$0xff]  ;;  %v293_v21 = vld [vmem:[%s6253_s3 + $0x50] sm:$0xff]  ;;  %vm2229_vm3 = vcmask 523264   ;;  %vm4428_vm4 = vcmask 253952   ;;  %s258_s10 = scalar_lea.vmem %s6256_s6, %s6258_s22  ;;  %vm4434_vm5 = vcmask 0  }
   0xe   : > { %v5385_v0 = vld [vmem:[%s252_s26] sm:$0xff]  ;;  %4821 = vmatprep.subr.mxu0 %v5334_v3  ;;  %4832 = vmatprep.subr.mxu1 %v5334_v3  ;;  %v298_v20 = vld [vmem:[%s6253_s3 + $0x78] sm:$0xff]  ;;  %v297_v22 = vld [vmem:[%s6253_s3 + $0x70] sm:$0xff] }
   0xf   : > { %v268_v1 = vmul.f32 %v5385_v0, %v5385_v0  ;;  %4822 = vmatpush3.msra.mxu0 %v285_v6  ;;  %4833 = vmatpush3.msra.mxu1 %v289_v7  ;;  %v287_v11 = vld [vmem:[%s6253_s3 + $0x20] sm:$0xff]  ;;  %v292_v23 = vld [vmem:[%s6253_s3 + $0x48] sm:$0xff]  ;;  %v302_v27 = vld [vmem:[%s6253_s3 + $0x98] sm:$0xff] }
  0x10   : > { %4823 = vmatprep.subr.mxu0 %v5334_v3  ;;  %4834 = vmatprep.subr.mxu1 %v5334_v3  ;;  %v4498_v16 = vld [vmem:[%s6255_s5] ss:$0 sm:$0xff]  ;;  %v296_v24 = vld [vmem:[%s6253_s3 + $0x68] sm:$0xff]  ;;  %v306_v28 = vld [vmem:[%s6253_s3 + $0xb8] sm:$0xff] }
  0x11   : > { %v270_v2 = vsel %vm269_vm0, %v268_v1, 0.0  ;;  %4824 = vmatpush3.msra.mxu0 %v284_v8  ;;  %4835 = vmatpush3.msra.mxu1 %v288_v9  ;;  %v291_v25 = vld [vmem:[%s6253_s3 + $0x40] sm:$0xff]  ;;  %v301_v29 = vld [vmem:[%s6253_s3 + $0x90] sm:$0xff]  ;;  %v300_v31 = vld [vmem:[%s6253_s3 + $0x88] sm:$0xff] }
  0x12   : > { %271 = vadd.xlane.f32.xlu0 %v270_v2  ;;  %4825 = vmatprep.subr.mxu0 %v5334_v3  ;;  %v295_v26 = vld [vmem:[%s6253_s3 + $0x60] sm:$0xff]  ;;  %v305_v30 = vld [vmem:[%s6253_s3 + $0xb0] sm:$0xff]  ;;  %v304_v32 = vld [vmem:[%s6253_s3 + $0xa8] sm:$0xff] }
  0x13   : > { %4836 = vmatprep.subr.mxu1 %v5334_v3  ;;  %4826 = vmatpush3.msra.mxu0 %v283_v10  ;;  %v299_v33 = vld [vmem:[%s6253_s3 + $0x80] sm:$0xff]  ;;  %v310_v35 = vld [vmem:[%s6253_s3 + $0xd8] sm:$0xff]  ;;  %v309_v37 = vld [vmem:[%s6253_s3 + $0xd0] sm:$0xff] }
  0x14   : > { %4837 = vmatpush3.msra.mxu1 %v287_v11  ;;  %4827 = vmatprep.mubr.msk.f32.mxu0 %vm5335_vm1, %v5334_v3  ;;  %v303_v34 = vld [vmem:[%s6253_s3 + $0xa0] sm:$0xff]  ;;  %v314_v36 = vld [vmem:[%s6253_s3 + $0xf8] sm:$0xff]  ;;  %v313_v38 = vld [vmem:[%s6253_s3 + $0xf0] sm:$0xff] }
  0x15   : > { %4838 = vmatprep.mubr.msk.f32.mxu1 %vm5335_vm1, %v5334_v3  ;;  %4841 = vmatprep.subr.mxu0 %v5334_v3  ;;  %v308_v39 = vld [vmem:[%s6253_s3 + $0xc8] sm:$0xff]  ;;  %v307_v41 = vld [vmem:[%s6253_s3 + $0xc0] sm:$0xff]  ;;  %v318_v43 = vld [vmem:[%s6253_s3 + $0x118] sm:$0xff] }
  0x16   : > { %4852 = vmatprep.subr.mxu1 %v5334_v3  ;;  %v312_v40 = vld [vmem:[%s6253_s3 + $0xe8] sm:$0xff]  ;;  %v311_v42 = vld [vmem:[%s6253_s3 + $0xe0] sm:$0xff]  ;;  %v322_v44 = vld [vmem:[%s6253_s3 + $0x138] sm:$0xff] }
  0x17   : > { %v317_v45 = vld [vmem:[%s6253_s3 + $0x110] sm:$0xff]  ;;  %v316_v47 = vld [vmem:[%s6253_s3 + $0x108] sm:$0xff]  ;;  %v315_v49 = vld [vmem:[%s6253_s3 + $0x100] sm:$0xff] }
  0x18   : > { %v321_v46 = vld [vmem:[%s6253_s3 + $0x130] sm:$0xff]  ;;  %v320_v48 = vld [vmem:[%s6253_s3 + $0x128] sm:$0xff]  ;;  %v319_v50 = vld [vmem:[%s6253_s3 + $0x120] sm:$0xff] }
  0x19   : > { %v326_v51 = vld [vmem:[%s6253_s3 + $0x158] sm:$0xff]  ;;  %v325_v53 = vld [vmem:[%s6253_s3 + $0x150] sm:$0xff]  ;;  %v324_v55 = vld [vmem:[%s6253_s3 + $0x148] sm:$0xff] }
  0x1a   : > { %v330_v52 = vld [vmem:[%s6253_s3 + $0x178] sm:$0xff]  ;;  %v329_v54 = vld [vmem:[%s6253_s3 + $0x170] sm:$0xff]  ;;  %v328_v56 = vld [vmem:[%s6253_s3 + $0x168] sm:$0xff] }
  0x1b   : > { %v323_v57 = vld [vmem:[%s6253_s3 + $0x140] sm:$0xff] }
  0x1c   : > { %v327_v58 = vld [vmem:[%s6253_s3 + $0x160] sm:$0xff] }
  0x9b   : > { %v272_v12 = vpop.xlane.xlu0 %271 }
  0x9c   : > { %v274_v13 = vmul.f32 0.03125, %v272_v12 }
  0x9e   : > { %v275_v14 = vadd.f32 1e-06, %v274_v13 }
  0xa0   : > { %5284 = vrsqrt.f32 %v275_v14 }
  0xad   : > { %v5285_v15 = vpop.eup %5284 }
  0xae   : > { %v277_v17 = vmul.f32 %v5285_v15, %v5385_v0 }
  0xb0   : > { %v5432_v18 = vmul.f32 %v4498_v16, %v277_v17 }
  0xb2   : > { %4828 = vmatmul.mubr.msk.f32.vlgmr.msra.gmra.mxu0 %vm269_vm0, %v5432_v18  ;;  %4839 = vmatmul.mubr.msk.f32.vlgmr.msra.gmra.mxu1 %vm269_vm0, %v5432_v18 }
  0xb3   : > { %4842 = vmatpush3.msra.mxu0 %v294_v19  ;;  %4853 = vmatpush3.msra.mxu1 %v298_v20 }
  0xb4   : > { %4843 = vmatprep.subr.mxu0 %v5334_v3  ;;  %4854 = vmatprep.subr.mxu1 %v5334_v3 }
  0xb5   : > { %4844 = vmatpush3.msra.mxu0 %v293_v21  ;;  %4855 = vmatpush3.msra.mxu1 %v297_v22  ;;  %v1480_v21 = vlaneseq  ;;  %v264_v22 = vld [vmem:[%s255_s15] sm:$0x1] }
  0xb6   : > { %4845 = vmatprep.subr.mxu0 %v5334_v3  ;;  %4856 = vmatprep.subr.mxu1 %v5334_v3 }
  0xb7   : > { %4846 = vmatpush3.msra.mxu0 %v292_v23  ;;  %4857 = vmatpush3.msra.mxu1 %v296_v24  ;;  %v265_v23 = vsub.f32 1.0, %v264_v22  ;;  %v1481_v24 = vshrl.u32 %v1480_v21, 7 }
  0xb8   : > { %4847 = vmatprep.subr.mxu0 %v5334_v3  ;;  %4858 = vmatprep.subr.mxu1 %v5334_v3 }
  0xb9   : > { %4848 = vmatpush3.msra.mxu0 %v291_v25  ;;  %4849 = vmatprep.mubr.msk.f32.mxu0 %vm5335_vm1, %v5334_v3  ;;  %v266_v25 = vmul.f32 -1e+09, %v265_v23 }
  0xba   : > { %4859 = vmatpush3.msra.mxu1 %v295_v26  ;;  %4860 = vmatprep.mubr.msk.f32.mxu1 %vm5335_vm1, %v5334_v3  ;;  %v1482_v26 = vsub.s32 0, %v1481_v24  ;;  %v1828_v24 = vld [vmem:[%s6254_s4 + $0x18] sm:$0xff] }
  0xbb   : > { %4850 = vmatmul.mubr.msk.f32.vlgmr.msra.gmra.mxu0 %vm269_vm0, %v5432_v18  ;;  %4861 = vmatmul.mubr.msk.f32.vlgmr.msra.gmra.mxu1 %vm269_vm0, %v5432_v18 }
  0xbc   : > { %4863 = vmatprep.subr.mxu0 %v5334_v3  ;;  %4874 = vmatprep.subr.mxu1 %v5334_v3 }
  0xbd   : > { %4864 = vmatpush3.msra.mxu0 %v302_v27  ;;  %4875 = vmatpush3.msra.mxu1 %v306_v28  ;;  %v5675_v27 = vld [vmem:[%s6251_s1] sm:$0xff]  ;;  %v5680_v28 = vld [vmem:[%s6251_s1 + $0x8] sm:$0xff] }
  0xbe   : > { %4865 = vmatprep.subr.mxu0 %v5334_v3  ;;  %4876 = vmatprep.subr.mxu1 %v5334_v3 }
  0xbf   : > { %4866 = vmatpush3.msra.mxu0 %v301_v29  ;;  %4877 = vmatpush3.msra.mxu1 %v305_v30  ;;  %v5682_v29 = vrot.slane %v266_v25, %v1482_v26  ;;  %v1827_v26 = vld [vmem:[%s6254_s4 + $0x10] sm:$0xff] }
  0xc0   : > { %4867 = vmatprep.subr.mxu0 %v5334_v3  ;;  %4878 = vmatprep.subr.mxu1 %v5334_v3 }
  0xc1   : > { %4868 = vmatpush3.msra.mxu0 %v300_v31  ;;  %4879 = vmatpush3.msra.mxu1 %v304_v32 }
  0xc2   : > { %4869 = vmatprep.subr.mxu0 %v5334_v3  ;;  %4880 = vmatprep.subr.mxu1 %v5334_v3 }
  0xc3   : > { %4870 = vmatpush3.msra.mxu0 %v299_v33  ;;  %4871 = vmatprep.mubr.msk.f32.mxu0 %vm5335_vm1, %v5334_v3 }
  0xc4   : > { %4881 = vmatpush3.msra.mxu1 %v303_v34  ;;  %4882 = vmatprep.mubr.msk.f32.mxu1 %vm5335_vm1, %v5334_v3 }
  0xc5   : > { %4872 = vmatmul.mubr.msk.f32.vlgmr.msra.gmra.mxu0 %vm269_vm0, %v5432_v18  ;;  %4883 = vmatmul.mubr.msk.f32.vlgmr.msra.gmra.mxu1 %vm269_vm0, %v5432_v18 }
  0xc6   : > { %4885 = vmatprep.subr.mxu0 %v5334_v3  ;;  %4896 = vmatprep.subr.mxu1 %v5334_v3 }
  0xc7   : > { %4886 = vmatpush3.msra.mxu0 %v310_v35  ;;  %4897 = vmatpush3.msra.mxu1 %v314_v36 }
  0xc8   : > { %4887 = vmatprep.subr.mxu0 %v5334_v3  ;;  %4898 = vmatprep.subr.mxu1 %v5334_v3 }
  0xc9   : > { %4888 = vmatpush3.msra.mxu0 %v309_v37  ;;  %4899 = vmatpush3.msra.mxu1 %v313_v38 }
  0xca   : > { %4889 = vmatprep.subr.mxu0 %v5334_v3  ;;  %4900 = vmatprep.subr.mxu1 %v5334_v3 }
  0xcb   : > { %4890 = vmatpush3.msra.mxu0 %v308_v39  ;;  %4901 = vmatpush3.msra.mxu1 %v312_v40  ;;  %v5693_v40 = vld [vmem:[%s6251_s1 + $0x10] sm:$0xff] }
  0xcc   : > { %4891 = vmatprep.subr.mxu0 %v5334_v3  ;;  %4902 = vmatprep.subr.mxu1 %v5334_v3 }
  0xcd   : > { %4892 = vmatpush3.msra.mxu0 %v307_v41  ;;  %4893 = vmatprep.mubr.msk.f32.mxu0 %vm5335_vm1, %v5334_v3  ;;  %v5698_v41 = vld [vmem:[%s6251_s1 + $0x18] sm:$0xff] }
  0xce   : > { %4903 = vmatpush3.msra.mxu1 %v311_v42  ;;  %4904 = vmatprep.mubr.msk.f32.mxu1 %vm5335_vm1, %v5334_v3 }
  0xcf   : > { %4894 = vmatmul.mubr.msk.f32.vlgmr.msra.gmra.mxu0 %vm269_vm0, %v5432_v18  ;;  %4905 = vmatmul.mubr.msk.f32.vlgmr.msra.gmra.mxu1 %vm269_vm0, %v5432_v18 }
  0xd0   : > { %4907 = vmatprep.subr.mxu0 %v5334_v3  ;;  %4918 = vmatprep.subr.mxu1 %v5334_v3 }
  0xd1   : > { %4908 = vmatpush3.msra.mxu0 %v318_v43  ;;  %4919 = vmatpush3.msra.mxu1 %v322_v44 }
  0xd2   : > { %4909 = vmatprep.subr.mxu0 %v5334_v3  ;;  %4920 = vmatprep.subr.mxu1 %v5334_v3 }
  0xd3   : > { %4910 = vmatpush3.msra.mxu0 %v317_v45  ;;  %4921 = vmatpush3.msra.mxu1 %v321_v46 }
  0xd4   : > { %4911 = vmatprep.subr.mxu0 %v5334_v3  ;;  %4922 = vmatprep.subr.mxu1 %v5334_v3 }
  0xd5   : > { %4912 = vmatpush3.msra.mxu0 %v316_v47  ;;  %4923 = vmatpush3.msra.mxu1 %v320_v48 }
  0xd6   : > { %4913 = vmatprep.subr.mxu0 %v5334_v3  ;;  %4924 = vmatprep.subr.mxu1 %v5334_v3 }
  0xd7   : > { %4914 = vmatpush3.msra.mxu0 %v315_v49  ;;  %4915 = vmatprep.mubr.msk.f32.mxu0 %vm5335_vm1, %v5334_v3 }
  0xd8   : > { %4925 = vmatpush3.msra.mxu1 %v319_v50  ;;  %4926 = vmatprep.mubr.msk.f32.mxu1 %vm5335_vm1, %v5334_v3 }
  0xd9   : > { %4916 = vmatmul.mubr.msk.f32.vlgmr.msra.gmra.mxu0 %vm269_vm0, %v5432_v18  ;;  %4927 = vmatmul.mubr.msk.f32.vlgmr.msra.gmra.mxu1 %vm269_vm0, %v5432_v18 }
  0xda   : > { %4929 = vmatprep.subr.mxu0 %v5334_v3  ;;  %4940 = vmatprep.subr.mxu1 %v5334_v3 }
  0xdb   : > { %4930 = vmatpush3.msra.mxu0 %v326_v51  ;;  %4941 = vmatpush3.msra.mxu1 %v330_v52 }
  0xdc   : > { %4931 = vmatprep.subr.mxu0 %v5334_v3  ;;  %4942 = vmatprep.subr.mxu1 %v5334_v3 }
  0xdd   : > { %4932 = vmatpush3.msra.mxu0 %v325_v53  ;;  %4943 = vmatpush3.msra.mxu1 %v329_v54 }
  0xde   : > { %4933 = vmatprep.subr.mxu0 %v5334_v3  ;;  %4944 = vmatprep.subr.mxu1 %v5334_v3 }
  0xdf   : > { %4934 = vmatpush3.msra.mxu0 %v324_v55  ;;  %4945 = vmatpush3.msra.mxu1 %v328_v56 }
  0xe0   : > { %4935 = vmatprep.subr.mxu0 %v5334_v3  ;;  %4946 = vmatprep.subr.mxu1 %v5334_v3 }
  0xe1   : > { %4936 = vmatpush3.msra.mxu0 %v323_v57  ;;  %4937 = vmatprep.mubr.msk.f32.mxu0 %vm5335_vm1, %v5334_v3 }
  0xe2   : > { %4947 = vmatpush3.msra.mxu1 %v327_v58  ;;  %4948 = vmatprep.mubr.msk.f32.mxu1 %vm5335_vm1, %v5334_v3 }
  0xe3   : > { %4938 = vmatmul.mubr.msk.f32.vlgmr.msra.gmra.mxu0 %vm269_vm0, %v5432_v18  ;;  %4949 = vmatmul.mubr.msk.f32.vlgmr.msra.gmra.mxu1 %vm269_vm0, %v5432_v18 }
  0xe4   : > { %4951 = vmatprep.subr.mxu0 %v5334_v3  ;;  %4956 = vmatprep.subr.mxu1 %v5334_v3 }
  0xe5   : > { %4953 = vmatprep.mubr.msk.f32.mxu0 %vm5335_vm1, %v5334_v3  ;;  %4958 = vmatprep.mubr.msk.f32.mxu1 %vm5335_vm1, %v5334_v3 }
 0x172   : > { %v400_v59 = vpop.f32.mrf.mxu0  ;;  %v470_v60 = vpop.f32.mrf.mxu1 }
 0x174   : > { %v4829_v61 = vpop.f32.mrf.mxu0  ;;  %v4840_v62 = vpop.f32.mrf.mxu1 }
 0x17b   : > { %v540_v63 = vpop.f32.mrf.mxu0  ;;  %v610_v1 = vpop.f32.mrf.mxu1 }
 0x17d   : > { %v4851_v2 = vpop.f32.mrf.mxu0  ;;  %v4862_v4 = vpop.f32.mrf.mxu1 }
 0x185   : > { %v680_v5 = vpop.f32.mrf.mxu0  ;;  %v750_v6 = vpop.f32.mrf.mxu1 }
 0x186   : > { %4952 = vmatpush3.xpose.msk.msra.mxu0 %vm1174_vm2, %v680_v5  ;;  %4957 = vmatpush3.xpose.msk.msra.mxu1 %vm1174_vm2, %v750_v6 }
 0x187   : > { %v4873_v7 = vpop.f32.mrf.mxu0  ;;  %v4884_v8 = vpop.f32.mrf.mxu1  ;;  %4961 = vmatprep.subr.mxu0 %v5334_v3  ;;  %4966 = vmatprep.subr.mxu1 %v5334_v3 }
 0x189   : > { %4954 = vmatmul.mubr.msk.f32.vlgmr.msra.gmra.mxu0 %vm1174_vm2, %v400_v59  ;;  %4959 = vmatmul.mubr.msk.f32.vlgmr.msra.gmra.mxu1 %vm1174_vm2, %v470_v60 }
 0x18a   : > { %4963 = vmatprep.mubr.msk.f32.mxu0 %vm5335_vm1, %v5334_v3  ;;  %4968 = vmatprep.mubr.msk.f32.mxu1 %vm5335_vm1, %v5334_v3 }
 0x18f   : > { %v820_v9 = vpop.f32.mrf.mxu0  ;;  %v890_v10 = vpop.f32.mrf.mxu1 }
 0x190   : > { %4962 = vmatpush3.xpose.msk.msra.mxu0 %vm1174_vm2, %v820_v9  ;;  %4967 = vmatpush3.xpose.msk.msra.mxu1 %vm1174_vm2, %v890_v10 }
 0x191   : > { %v4895_v11 = vpop.f32.mrf.mxu0  ;;  %v4906_v12 = vpop.f32.mrf.mxu1  ;;  %4971 = vmatprep.subr.mxu0 %v5334_v3  ;;  %4976 = vmatprep.subr.mxu1 %v5334_v3 }
 0x193   : > { %4964 = vmatmul.mubr.msk.f32.vlgmr.msra.gmra.mxu0 %vm1174_vm2, %v540_v63  ;;  %4969 = vmatmul.mubr.msk.f32.vlgmr.msra.gmra.mxu1 %vm1174_vm2, %v610_v1 }
 0x194   : > { %4973 = vmatprep.mubr.msk.f32.mxu0 %vm5335_vm1, %v5334_v3  ;;  %4978 = vmatprep.mubr.msk.f32.mxu1 %vm5335_vm1, %v5334_v3 }
 0x199   : > { %v960_v13 = vpop.f32.mrf.mxu0  ;;  %v1030_v14 = vpop.f32.mrf.mxu1 }
 0x19a   : > { %4972 = vmatpush3.msra.mxu0 %v960_v13  ;;  %4977 = vmatpush3.msra.mxu1 %v1030_v14 }
 0x19b   : > { %v4917_v15 = vpop.f32.mrf.mxu0  ;;  %v4928_v16 = vpop.f32.mrf.mxu1  ;;  %4981 = vmatprep.subr.mxu0 %v5334_v3  ;;  %4986 = vmatprep.subr.mxu1 %v5334_v3 }
 0x1a3   : > { %v5664_v17 = vpop.f32.mrf.mxu0  ;;  %v5666_v18 = vpop.f32.mrf.mxu1 }
 0x1a5   : > { %v4939_v19 = vpop.f32.mrf.mxu0  ;;  %v4950_v20 = vpop.f32.mrf.mxu1 }
 0x249   : > { %v1247_v30 = vpop.f32.mrf.mxu0  ;;  %v1323_v31 = vpop.f32.mrf.mxu1 }
 0x24a   : > { %v1248_v32 = vadd.f32 %v1247_v30, %v5675_v27  ;;  %v1324_v33 = vadd.f32 %v1323_v31, %v5680_v28 }
 0x24b   : > { %v4955_v34 = vpop.f32.mrf.mxu0  ;;  %v4960_v35 = vpop.f32.mrf.mxu1 }
 0x24c   : > { %v1486_v36 = vadd.f32 %v5682_v29, %v1324_v33  ;;  %v1485_v37 = vadd.f32 %v5682_v29, %v1248_v32 }
 0x24e   : > { %v1492_v38 = vsel %vm1174_vm2, %v1486_v36, -inf  ;;  %v1489_v39 = vsel %vm1174_vm2, %v1485_v37, -inf }
 0x24f   : > { %1493 = vmax.xlane.f32.xlu1 %v1492_v38  ;;  %1490 = vmax.xlane.f32.xlu0 %v1489_v39 }
 0x253   : > { %v1399_v42 = vpop.f32.mrf.mxu0  ;;  %v1475_v43 = vpop.f32.mrf.mxu1 }
 0x254   : > { %v1400_v44 = vadd.f32 %v1399_v42, %v5693_v40  ;;  %v1476_v45 = vadd.f32 %v1475_v43, %v5698_v41 }
 0x255   : > { %v4965_v46 = vpop.f32.mrf.mxu0  ;;  %v4970_v47 = vpop.f32.mrf.mxu1 }
 0x256   : > { %v1488_v48 = vadd.f32 %v5682_v29, %v1476_v45  ;;  %v1487_v49 = vadd.f32 %v5682_v29, %v1400_v44 }
 0x258   : > { %v1498_v50 = vsel %vm1174_vm2, %v1488_v48, -inf  ;;  %v1495_v51 = vsel %vm1174_vm2, %v1487_v49, -inf }
 0x259   : > { %1499 = vmax.xlane.f32.xlu0 %v1498_v50  ;;  %1496 = vmax.xlane.f32.xlu1 %v1495_v51 }
 0x2d8   : > { %v1494_v52 = vpop.xlane.xlu1 %1493  ;;  %v1491_v53 = vpop.xlane.xlu0 %1490 }
 0x2d9   : > { %v1502_v54 = vsub.f32 %v1486_v36, %v1494_v52  ;;  %v1501_v55 = vsub.f32 %v1485_v37, %v1491_v53 }
 0x2db   : > { %v1507_v56 = vmul.f32 1.442695, %v1502_v54  ;;  %v1505_v57 = vmul.f32 1.442695, %v1501_v55 }
 0x2dd   : > { %5286 = vpow2.f32 %v1507_v56 }
 0x2de   : > { %5288 = vpow2.f32 %v1505_v57  ;;  %v2146_v57 = vld [vmem:[%s6255_s5 + $0x1a] sm:$0xff] }
 0x2e2   : > { %v1500_v58 = vpop.xlane.xlu0 %1499  ;;  %v1497_v59 = vpop.xlane.xlu1 %1496 }
 0x2e3   : > { %v1504_v60 = vsub.f32 %v1488_v48, %v1500_v58  ;;  %v1503_v61 = vsub.f32 %v1487_v49, %v1497_v59  ;;  %v2145_v58 = vld [vmem:[%s6255_s5 + $0x12] sm:$0xff]  ;;  %v2144_v59 = vld [vmem:[%s6255_s5 + $0xa] sm:$0xff] }
 0x2e5   : > { %v1511_v62 = vmul.f32 1.442695, %v1504_v60  ;;  %v1509_v63 = vmul.f32 1.442695, %v1503_v61  ;;  %v2228_v60 = vld [vmem:[%s6255_s5 + $0x5a] sm:$0xff]  ;;  %v2227_v61 = vld [vmem:[%s6255_s5 + $0x52] sm:$0xff] }
 0x2e7   : > { %5290 = vpow2.f32 %v1511_v62  ;;  %v2226_v62 = vld [vmem:[%s6255_s5 + $0x4a] sm:$0xff] }
 0x2e8   : > { %5292 = vpow2.f32 %v1509_v63  ;;  %v2225_v63 = vld [vmem:[%s6255_s5 + $0x42] sm:$0xff] }
 0x2ea   : > { %v5287_v1 = vpop.eup %5286 }
 0x2eb   : > { %v5289_v2 = vpop.eup %5288  ;;  %v1516_v4 = vsel %vm1174_vm2, %v5287_v1, 0.0 }
 0x2ec   : > { %1517 = vadd.xlane.f32.xlu0 %v1516_v4  ;;  %v1513_v5 = vsel %vm1174_vm2, %v5289_v2, 0.0 }
 0x2ed   : > { %1514 = vadd.xlane.f32.xlu1 %v1513_v5 }
 0x2f4   : > { %v5291_v6 = vpop.eup %5290 }
 0x2f5   : > { %v5293_v7 = vpop.eup %5292  ;;  %v1522_v8 = vsel %vm1174_vm2, %v5291_v6, 0.0 }
 0x2f6   : > { %1523 = vadd.xlane.f32.xlu0 %v1522_v8  ;;  %v1519_v9 = vsel %vm1174_vm2, %v5293_v7, 0.0  ;;  %v4527_v8 = vld [vmem:[%s6255_s5 + $0x1] ss:$0 sm:$0xff] }
 0x2f7   : > { %1520 = vadd.xlane.f32.xlu1 %v1519_v9 }
 0x375   : > { %v1518_v10 = vpop.xlane.xlu0 %1517 }
 0x376   : > { %5294 = vrcp.f32 %v1518_v10  ;;  %v1515_v11 = vpop.xlane.xlu1 %1514 }
 0x377   : > { %5296 = vrcp.f32 %v1515_v11  ;;  %v2222_v11 = vld [vmem:[%s6255_s5 + $0x2a] sm:$0xff] }
 0x37f   : > { %v1524_v12 = vpop.xlane.xlu0 %1523 }
 0x380   : > { %5298 = vrcp.f32 %v1524_v12  ;;  %v1521_v13 = vpop.xlane.xlu1 %1520  ;;  %v2221_v12 = vld [vmem:[%s6255_s5 + $0x22] sm:$0xff] }
 0x381   : > { %5300 = vrcp.f32 %v1521_v13 }
 0x383   : > { %v5295_v14 = vpop.eup %5294 }
 0x384   : > { %v5297_v15 = vpop.eup %5296  ;;  %v1528_v16 = vmul.f32 %v5295_v14, %v5287_v1  ;;  %v2224_v1 = vld [vmem:[%s6255_s5 + $0x3a] sm:$0xff] }
 0x385   : > { %v1526_v19 = vmul.f32 %v5297_v15, %v5289_v2  ;;  %v2223_v2 = vld [vmem:[%s6255_s5 + $0x32] sm:$0xff] }
 0x386   : > { %4979 = vmatmul.mubr.msk.f32.vlgmr.msra.gmra.mxu1 %vm1174_vm2, %v1528_v16 }
 0x387   : > { %4974 = vmatmul.mubr.msk.f32.vlgmr.msra.gmra.mxu0 %vm1174_vm2, %v1526_v19  ;;  %4987 = vmatpush3.msra.mxu1 %v5666_v18  ;;  %v1826_v18 = vld [vmem:[%s6254_s4 + $0x8] sm:$0xff] }
 0x388   : > { %4982 = vmatpush3.msra.mxu0 %v5664_v17  ;;  %4983 = vmatprep.mubr.msk.f32.mxu0 %vm5335_vm1, %v5334_v3  ;;  %v1825_v17 = vld [vmem:[%s6254_s4] sm:$0xff] }
 0x389   : > { %4988 = vmatprep.mubr.msk.f32.mxu1 %vm5335_vm1, %v5334_v3  ;;  %4991 = vmatprep.subr.mxu0 %v5334_v3 }
 0x38a   : > { %4996 = vmatprep.subr.mxu1 %v5334_v3 }
 0x38d   : > { %v5299_v20 = vpop.eup %5298 }
 0x38e   : > { %v5301_v21 = vpop.eup %5300  ;;  %v1532_v22 = vmul.f32 %v5299_v20, %v5291_v6 }
 0x38f   : > { %v1530_v23 = vmul.f32 %v5301_v21, %v5293_v7 }
 0x390   : > { %4989 = vmatmul.mubr.msk.f32.vlgmr.msra.gmra.mxu1 %vm1174_vm2, %v1532_v22 }
 0x391   : > { %4984 = vmatmul.mubr.msk.f32.vlgmr.msra.gmra.mxu0 %vm1174_vm2, %v1530_v23  ;;  %4998 = vmatprep.mubr.msk.f32.mxu1 %vm5335_vm1, %v5334_v3  ;;  %v4534_v23 = vld [vmem:[%s6253_s3 + $0x198] sm:$0xff] }
 0x392   : > { %4993 = vmatprep.mubr.msk.f32.mxu0 %vm5335_vm1, %v5334_v3  ;;  %4992 = vmatpush3.msra.mxu0 %v1825_v17  ;;  %v4542_v17 = vld [vmem:[%s6253_s3 + $0x1d8] sm:$0xff] }
 0x393   : > { %4997 = vmatpush3.msra.mxu1 %v1826_v18  ;;  %5001 = vmatprep.subr.mxu0 %v5334_v3  ;;  %v4533_v18 = vld [vmem:[%s6253_s3 + $0x190] sm:$0xff] }
 0x394   : > { %5006 = vmatprep.subr.mxu1 %v5334_v3 }
 0x446   : > { %v1675_v25 = vpop.f32.mrf.mxu1 }
 0x447   : > { %v1602_v30 = vpop.f32.mrf.mxu0  ;;  %4999 = vmatmul.mubr.msk.f32.vlgmr.msra.gmra.mxu1 %vm1174_vm2, %v1675_v25  ;;  %v4532_v25 = vld [vmem:[%s6253_s3 + $0x188] sm:$0xff] }
 0x448   : > { %4994 = vmatmul.mubr.msk.f32.vlgmr.msra.gmra.mxu0 %vm1174_vm2, %v1602_v30  ;;  %v4980_v31 = vpop.f32.mrf.mxu1  ;;  %5007 = vmatpush3.msra.mxu1 %v1828_v24  ;;  %v4541_v24 = vld [vmem:[%s6253_s3 + $0x1d0] sm:$0xff]  ;;  %v4531_v30 = vld [vmem:[%s6253_s3 + $0x180] sm:$0xff] }
 0x449   : > { %v4975_v32 = vpop.f32.mrf.mxu0  ;;  %5002 = vmatpush3.msra.mxu0 %v1827_v26  ;;  %5003 = vmatprep.mubr.msk.f32.mxu0 %vm5335_vm1, %v5334_v3  ;;  %v4540_v26 = vld [vmem:[%s6253_s3 + $0x1c8] sm:$0xff]  ;;  %v4539_v31 = vld [vmem:[%s6253_s3 + $0x1c0] sm:$0xff] }
 0x44a   : > { %5008 = vmatprep.mubr.msk.f32.mxu1 %vm5335_vm1, %v5334_v3  ;;  %5011 = vmatprep.subr.mxu0 %v5334_v3 }
 0x44b   : > { %5022 = vmatprep.subr.mxu1 %v5334_v3 }
 0x450   : > { %v1821_v33 = vpop.f32.mrf.mxu1 }
 0x451   : > { %v1748_v34 = vpop.f32.mrf.mxu0  ;;  %5009 = vmatmul.mubr.msk.f32.vlgmr.msra.gmra.mxu1 %vm1174_vm2, %v1821_v33 }
 0x452   : > { %5004 = vmatmul.mubr.msk.f32.vlgmr.msra.gmra.mxu0 %vm1174_vm2, %v1748_v34  ;;  %v4990_v35 = vpop.f32.mrf.mxu1  ;;  %5038 = vmatprep.mubr.msk.f32.mxu1 %vm5335_vm1, %v5334_v3 }
 0x453   : > { %v4985_v36 = vpop.f32.mrf.mxu0  ;;  %5019 = vmatprep.mubr.msk.f32.mxu0 %vm5335_vm1, %v5334_v3  ;;  %5012 = vmatpush3.msra.mxu0 %v2146_v57  ;;  %v4554_v57 = vld [vmem:[%s6253_s3 + $0x238] sm:$0xff] }
 0x454   : > { %5013 = vmatprep.subr.mxu0 %v5334_v3  ;;  %5023 = vmatpush3.msra.mxu1 %v2228_v60  ;;  %v4530_v36 = vld [vmem:[%s6255_s5 + $0x62] ss:$0 sm:$0xff]  ;;  %v4552_v60 = vld [vmem:[%s6253_s3 + $0x228] sm:$0xff] }
 0x455   : > { %5014 = vmatpush3.msra.mxu0 %v2145_v58  ;;  %5024 = vmatprep.subr.mxu1 %v5334_v3  ;;  %v4566_v58 = vld [vmem:[%s6253_s3 + $0x298] sm:$0xff] }
 0x456   : > { %5015 = vmatprep.subr.mxu0 %v5334_v3  ;;  %5025 = vmatpush3.msra.mxu1 %v2227_v61  ;;  %v4564_v61 = vld [vmem:[%s6253_s3 + $0x288] sm:$0xff] }
 0x457   : > { %5016 = vmatpush3.msra.mxu0 %v2144_v59  ;;  %5026 = vmatprep.subr.mxu1 %v5334_v3  ;;  %v4553_v59 = vld [vmem:[%s6253_s3 + $0x230] sm:$0xff] }
 0x458   : > { %5017 = vmatprep.subr.mxu0 %v5334_v3  ;;  %5027 = vmatpush3.msra.mxu1 %v2226_v62  ;;  %v4551_v62 = vld [vmem:[%s6253_s3 + $0x220] sm:$0xff] }
 0x459   : > { %5028 = vmatprep.subr.mxu1 %v5334_v3 }
 0x45a   : > { %5029 = vmatpush3.msra.mxu1 %v2225_v63  ;;  %v4563_v63 = vld [vmem:[%s6253_s3 + $0x280] sm:$0xff] }
 0x45b   : > { %5030 = vmatprep.subr.mxu1 %v5334_v3 }
 0x45c   : > { %5031 = vmatpush3.msra.mxu1 %v2224_v1  ;;  %v4562_v1 = vld [vmem:[%s6253_s3 + $0x278] sm:$0xff] }
 0x45d   : > { %5032 = vmatprep.subr.mxu1 %v5334_v3 }
 0x45e   : > { %5033 = vmatpush3.msra.mxu1 %v2223_v2  ;;  %v4574_v2 = vld [vmem:[%s6253_s3 + $0x2d8] sm:$0xff] }
 0x45f   : > { %5034 = vmatprep.subr.mxu1 %v5334_v3 }
 0x460   : > { %5035 = vmatpush3.msra.mxu1 %v2222_v11  ;;  %v4569_v11 = vld [vmem:[%s6253_s3 + $0x2b0] sm:$0xff] }
 0x461   : > { %5036 = vmatprep.subr.mxu1 %v5334_v3 }
 0x462   : > { %5037 = vmatpush3.msra.mxu1 %v2221_v12  ;;  %v4568_v12 = vld [vmem:[%s6253_s3 + $0x2a8] sm:$0xff] }
 0x463   : > { %5063 = vmatprep.subr.mxu1 %v5334_v3 }
 0x507   : > { %v1971_v37 = vpop.f32.mrf.mxu1 }
 0x508   : > { %v1898_v38 = vpop.f32.mrf.mxu0  ;;  %v2122_v44 = vsel %vm269_vm0, %v1971_v37, 0.0 }
 0x509   : > { %v5000_v39 = vpop.f32.mrf.mxu1  ;;  %v2121_v43 = vsel %vm269_vm0, %v1898_v38, 0.0 }
 0x50a   : > { %v4995_v42 = vpop.f32.mrf.mxu0  ;;  %v2123_v46 = vadd.f32 %v2122_v44, %v2121_v43  ;;  %v4538_v39 = vld [vmem:[%s6253_s3 + $0x1b8] sm:$0xff]  ;;  %v4537_v43 = vld [vmem:[%s6253_s3 + $0x1b0] sm:$0xff] }
 0x50b   : > { %v4550_v42 = vld [vmem:[%s6253_s3 + $0x218] sm:$0xff]  ;;  %v4549_v44 = vld [vmem:[%s6253_s3 + $0x210] sm:$0xff] }
 0x511   : > { %v2117_v45 = vpop.f32.mrf.mxu1 }
 0x512   : > { %v2044_v47 = vpop.f32.mrf.mxu0  ;;  %v2126_v52 = vsel %vm269_vm0, %v2117_v45, 0.0  ;;  %v4536_v45 = vld [vmem:[%s6253_s3 + $0x1a8] sm:$0xff] }
 0x513   : > { %v2124_v48 = vsel %vm269_vm0, %v2044_v47, 0.0  ;;  %v5010_v49 = vpop.f32.mrf.mxu1  ;;  %v4535_v47 = vld [vmem:[%s6253_s3 + $0x1a0] sm:$0xff] }
 0x514   : > { %v2125_v50 = vadd.f32 %v2124_v48, %v2123_v46  ;;  %v5005_v51 = vpop.f32.mrf.mxu0  ;;  %v4548_v46 = vld [vmem:[%s6253_s3 + $0x208] sm:$0xff]  ;;  %v4547_v48 = vld [vmem:[%s6253_s3 + $0x200] sm:$0xff]  ;;  %v4546_v49 = vld [vmem:[%s6253_s3 + $0x1f8] sm:$0xff] }
 0x515   : > { %v4545_v51 = vld [vmem:[%s6253_s3 + $0x1f0] sm:$0xff] }
 0x516   : > { %v2127_v53 = vadd.f32 %v2126_v52, %v2125_v50  ;;  %v4558_v50 = vld [vmem:[%s6253_s3 + $0x258] sm:$0xff]  ;;  %v4557_v52 = vld [vmem:[%s6253_s3 + $0x250] sm:$0xff] }
 0x518   : > { %v2128_v54 = vadd.f32 %v2127_v53, %v5385_v0  ;;  %v2143_v0 = vld [vmem:[%s6255_s5 + $0x2] sm:$0xff] }
 0x519   : > { %5018 = vmatpush3.msra.mxu0 %v2143_v0  ;;  %v4544_v53 = vld [vmem:[%s6253_s3 + $0x1e8] sm:$0xff]  ;;  %v4565_v0 = vld [vmem:[%s6253_s3 + $0x290] sm:$0xff] }
 0x51a   : > { %v2130_v55 = vmul.f32 %v2128_v54, %v2128_v54  ;;  %5041 = vmatprep.subr.mxu0 %v5334_v3 }
 0x51c   : > { %v2131_v56 = vsel %vm269_vm0, %v2130_v55, 0.0  ;;  %v4543_v55 = vld [vmem:[%s6253_s3 + $0x1e0] sm:$0xff] }
 0x51d   : > { %2132 = vadd.xlane.f32.xlu1 %v2131_v56  ;;  %v4555_v56 = vld [vmem:[%s6253_s3 + $0x240] sm:$0xff] }
 0x5a6   : > { %v2133_v4 = vpop.xlane.xlu1 %2132 }
 0x5a7   : > { %v2134_v5 = vmul.f32 0.03125, %v2133_v4  ;;  %v4561_v4 = vld [vmem:[%s6253_s3 + $0x270] sm:$0xff] }
 0x5a9   : > { %v2135_v6 = vadd.f32 1e-06, %v2134_v5  ;;  %v4573_v5 = vld [vmem:[%s6253_s3 + $0x2d0] sm:$0xff] }
 0x5ab   : > { %5302 = vrsqrt.f32 %v2135_v6  ;;  %v4560_v6 = vld [vmem:[%s6253_s3 + $0x268] sm:$0xff] }
 0x5b8   : > { %v5303_v7 = vpop.eup %5302 }
 0x5b9   : > { %v2137_v9 = vmul.f32 %v5303_v7, %v2128_v54  ;;  %v4572_v7 = vld [vmem:[%s6253_s3 + $0x2c8] sm:$0xff] }
 0x5bb   : > { %v2142_v10 = vmul.f32 %v4527_v8, %v2137_v9  ;;  %v4559_v8 = vld [vmem:[%s6253_s3 + $0x260] sm:$0xff] }
 0x5bc   : > { %v4571_v9 = vld [vmem:[%s6253_s3 + $0x2c0] sm:$0xff] }
 0x5bd   : > { %5020 = vmatmul.mubr.msk.f32.vlgmr.msra.gmra.mxu0 %vm269_vm0, %v2142_v10  ;;  %v4570_v10 = vld [vmem:[%s6253_s3 + $0x2b8] sm:$0xff] }
 0x5be   : > { %5049 = vmatprep.mubr.msk.f32.mxu0 %vm5335_vm1, %v5334_v3  ;;  %5042 = vmatpush3.msra.mxu0 %v4534_v23 }
 0x5bf   : > { %5043 = vmatprep.subr.mxu0 %v5334_v3 }
 0x5c0   : > { %5044 = vmatpush3.msra.mxu0 %v4533_v18 }
 0x5c1   : > { %5045 = vmatprep.subr.mxu0 %v5334_v3 }
 0x5c2   : > { %5046 = vmatpush3.msra.mxu0 %v4532_v25 }
 0x5c3   : > { %5047 = vmatprep.subr.mxu0 %v5334_v3 }
 0x5c4   : > { %5048 = vmatpush3.msra.mxu0 %v4531_v30 }
 0x5c5   : > { %5052 = vmatprep.subr.mxu0 %v5334_v3 }
 0x67d   : > { %v2216_v13 = vpop.f32.mrf.mxu0 }
 0x67e   : > { %v2220_v14 = vmax.f32 %v2216_v13, 0.0  ;;  %v4567_v13 = vld [vmem:[%s6253_s3 + $0x2a0] sm:$0xff] }
 0x67f   : > { %v5021_v15 = vpop.f32.mrf.mxu0 }
 0x680   : > { %5039 = vmatmul.mubr.msk.f32.vlgmr.msra.gmra.mxu1 %vm2229_vm3, %v2220_v14  ;;  %v4578_v14 = vld [vmem:[%s6253_s3 + $0x2f8] sm:$0xff]  ;;  %v4577_v15 = vld [vmem:[%s6253_s3 + $0x2f0] sm:$0xff] }
 0x681   : > { %5071 = vmatprep.mubr.msk.f32.mxu1 %vm5335_vm1, %v5334_v3  ;;  %5064 = vmatpush3.msra.mxu1 %v4542_v17 }
 0x682   : > { %5065 = vmatprep.subr.mxu1 %v5334_v3 }
 0x683   : > { %5066 = vmatpush3.msra.mxu1 %v4541_v24 }
 0x684   : > { %5067 = vmatprep.subr.mxu1 %v5334_v3 }
 0x685   : > { %5068 = vmatpush3.msra.mxu1 %v4540_v26 }
 0x686   : > { %5069 = vmatprep.subr.mxu1 %v5334_v3 }
 0x687   : > { %5070 = vmatpush3.msra.mxu1 %v4539_v31 }
 0x688   : > { %5085 = vmatprep.subr.mxu1 %v5334_v3 }
 0x740   : > { %v2299_v16 = vpop.f32.mrf.mxu1 }
 0x741   : > { %v5817_v19 = vadd.f32 %v2299_v16, %v2128_v54  ;;  %v4556_v54 = vld [vmem:[%s6253_s3 + $0x248] sm:$0xff] }
 0x742   : > { %v5040_v20 = vpop.f32.mrf.mxu1  ;;  %v4576_v16 = vld [vmem:[%s6253_s3 + $0x2e8] sm:$0xff] }
 0x743   : > { %v2305_v21 = vmul.f32 %v5817_v19, %v5817_v19  ;;  %v4575_v20 = vld [vmem:[%s6253_s3 + $0x2e0] sm:$0xff] }
 0x745   : > { %v2306_v22 = vsel %vm269_vm0, %v2305_v21, 0.0 }
 0x746   : > { %2307 = vadd.xlane.f32.xlu0 %v2306_v22 }
 0x7cf   : > { %v2308_v32 = vpop.xlane.xlu0 %2307 }
 0x7d0   : > { %v2309_v33 = vmul.f32 0.03125, %v2308_v32 }
 0x7d2   : > { %v2310_v34 = vadd.f32 1e-06, %v2309_v33 }
 0x7d4   : > { %5304 = vrsqrt.f32 %v2310_v34 }
 0x7e1   : > { %v5305_v35 = vpop.eup %5304 }
 0x7e2   : > { %v2312_v37 = vmul.f32 %v5305_v35, %v5817_v19 }
 0x7e4   : > { %v5858_v38 = vmul.f32 %v4530_v36, %v2312_v37 }
 0x7e6   : > { %5050 = vmatmul.mubr.msk.f32.vlgmr.msra.gmra.mxu0 %vm269_vm0, %v5858_v38  ;;  %5072 = vmatmul.mubr.msk.f32.vlgmr.msra.gmra.mxu1 %vm269_vm0, %v5858_v38 }
 0x7e7   : > { %5053 = vmatpush3.msra.mxu0 %v4538_v39  ;;  %5086 = vmatpush3.msra.mxu1 %v4550_v42 }
 0x7e8   : > { %5054 = vmatprep.subr.mxu0 %v5334_v3  ;;  %5087 = vmatprep.subr.mxu1 %v5334_v3 }
 0x7e9   : > { %5055 = vmatpush3.msra.mxu0 %v4537_v43  ;;  %5088 = vmatpush3.msra.mxu1 %v4549_v44 }
 0x7ea   : > { %5056 = vmatprep.subr.mxu0 %v5334_v3  ;;  %5089 = vmatprep.subr.mxu1 %v5334_v3 }
 0x7eb   : > { %5057 = vmatpush3.msra.mxu0 %v4536_v45  ;;  %5090 = vmatpush3.msra.mxu1 %v4548_v46 }
 0x7ec   : > { %5058 = vmatprep.subr.mxu0 %v5334_v3  ;;  %5091 = vmatprep.subr.mxu1 %v5334_v3 }
 0x7ed   : > { %5059 = vmatpush3.msra.mxu0 %v4535_v47  ;;  %5060 = vmatprep.mubr.msk.f32.mxu0 %vm5335_vm1, %v5334_v3 }
 0x7ee   : > { %5092 = vmatpush3.msra.mxu1 %v4547_v48  ;;  %5093 = vmatprep.mubr.msk.f32.mxu1 %vm5335_vm1, %v5334_v3 }
 0x7ef   : > { %5061 = vmatmul.mubr.msk.f32.vlgmr.msra.gmra.mxu0 %vm269_vm0, %v5858_v38  ;;  %5074 = vmatprep.subr.mxu0 %v5334_v3 }
 0x7f0   : > { %5094 = vmatmul.mubr.msk.f32.vlgmr.msra.gmra.mxu1 %vm269_vm0, %v5858_v38  ;;  %5107 = vmatprep.subr.mxu1 %v5334_v3 }
 0x7f1   : > { %5075 = vmatpush3.msra.mxu0 %v4546_v49  ;;  %5108 = vmatpush3.msra.mxu1 %v4558_v50 }
 0x7f2   : > { %5076 = vmatprep.subr.mxu0 %v5334_v3  ;;  %5109 = vmatprep.subr.mxu1 %v5334_v3 }
 0x7f3   : > { %5077 = vmatpush3.msra.mxu0 %v4545_v51  ;;  %5110 = vmatpush3.msra.mxu1 %v4557_v52 }
 0x7f4   : > { %5078 = vmatprep.subr.mxu0 %v5334_v3  ;;  %5111 = vmatprep.subr.mxu1 %v5334_v3 }
 0x7f5   : > { %5079 = vmatpush3.msra.mxu0 %v4544_v53  ;;  %5112 = vmatpush3.msra.mxu1 %v4556_v54 }
 0x7f6   : > { %5080 = vmatprep.subr.mxu0 %v5334_v3  ;;  %5113 = vmatprep.subr.mxu1 %v5334_v3 }
 0x7f7   : > { %5081 = vmatpush3.msra.mxu0 %v4543_v55  ;;  %5082 = vmatprep.mubr.msk.f32.mxu0 %vm5335_vm1, %v5334_v3 }
 0x7f8   : > { %5114 = vmatpush3.msra.mxu1 %v4555_v56  ;;  %5115 = vmatprep.mubr.msk.f32.mxu1 %vm5335_vm1, %v5334_v3 }
 0x7f9   : > { %5083 = vmatmul.mubr.msk.f32.vlgmr.msra.gmra.mxu0 %vm269_vm0, %v5858_v38  ;;  %5096 = vmatprep.subr.mxu0 %v5334_v3 }
 0x7fa   : > { %5116 = vmatmul.mubr.msk.f32.vlgmr.msra.gmra.mxu1 %vm269_vm0, %v5858_v38  ;;  %5129 = vmatprep.subr.mxu1 %v5334_v3 }
 0x7fb   : > { %5097 = vmatpush3.msra.mxu0 %v4554_v57  ;;  %5130 = vmatpush3.msra.mxu1 %v4566_v58 }
 0x7fc   : > { %5098 = vmatprep.subr.mxu0 %v5334_v3  ;;  %5131 = vmatprep.subr.mxu1 %v5334_v3 }
 0x7fd   : > { %5099 = vmatpush3.msra.mxu0 %v4553_v59  ;;  %5132 = vmatpush3.msra.mxu1 %v4565_v0 }
 0x7fe   : > { %5100 = vmatprep.subr.mxu0 %v5334_v3  ;;  %5133 = vmatprep.subr.mxu1 %v5334_v3 }
 0x7ff   : > { %5101 = vmatpush3.msra.mxu0 %v4552_v60  ;;  %5134 = vmatpush3.msra.mxu1 %v4564_v61 }
 0x800   : > { %5102 = vmatprep.subr.mxu0 %v5334_v3  ;;  %5135 = vmatprep.subr.mxu1 %v5334_v3 }
 0x801   : > { %5103 = vmatpush3.msra.mxu0 %v4551_v62  ;;  %5104 = vmatprep.mubr.msk.f32.mxu0 %vm5335_vm1, %v5334_v3 }
 0x802   : > { %5136 = vmatpush3.msra.mxu1 %v4563_v63  ;;  %5137 = vmatprep.mubr.msk.f32.mxu1 %vm5335_vm1, %v5334_v3 }
 0x803   : > { %5105 = vmatmul.mubr.msk.f32.vlgmr.msra.gmra.mxu0 %vm269_vm0, %v5858_v38  ;;  %5118 = vmatprep.subr.mxu0 %v5334_v3 }
 0x804   : > { %5138 = vmatmul.mubr.msk.f32.vlgmr.msra.gmra.mxu1 %vm269_vm0, %v5858_v38  ;;  %5151 = vmatprep.subr.mxu1 %v5334_v3 }
 0x805   : > { %5119 = vmatpush3.msra.mxu0 %v4562_v1  ;;  %5152 = vmatpush3.msra.mxu1 %v4574_v2 }
 0x806   : > { %5120 = vmatprep.subr.mxu0 %v5334_v3  ;;  %5153 = vmatprep.subr.mxu1 %v5334_v3 }
 0x807   : > { %5121 = vmatpush3.msra.mxu0 %v4561_v4  ;;  %5154 = vmatpush3.msra.mxu1 %v4573_v5 }
 0x808   : > { %5122 = vmatprep.subr.mxu0 %v5334_v3  ;;  %5155 = vmatprep.subr.mxu1 %v5334_v3 }
 0x809   : > { %5123 = vmatpush3.msra.mxu0 %v4560_v6  ;;  %5156 = vmatpush3.msra.mxu1 %v4572_v7 }
 0x80a   : > { %5124 = vmatprep.subr.mxu0 %v5334_v3  ;;  %5157 = vmatprep.subr.mxu1 %v5334_v3 }
 0x80b   : > { %5125 = vmatpush3.msra.mxu0 %v4559_v8  ;;  %5126 = vmatprep.mubr.msk.f32.mxu0 %vm5335_vm1, %v5334_v3 }
 0x80c   : > { %5158 = vmatpush3.msra.mxu1 %v4571_v9  ;;  %5159 = vmatprep.mubr.msk.f32.mxu1 %vm5335_vm1, %v5334_v3 }
 0x80d   : > { %5127 = vmatmul.mubr.msk.f32.vlgmr.msra.gmra.mxu0 %vm269_vm0, %v5858_v38  ;;  %5140 = vmatprep.subr.mxu0 %v5334_v3 }
 0x80e   : > { %5160 = vmatmul.mubr.msk.f32.vlgmr.msra.gmra.mxu1 %vm269_vm0, %v5858_v38  ;;  %5141 = vmatpush3.msra.mxu0 %v4570_v10 }
 0x80f   : > { %5142 = vmatprep.subr.mxu0 %v5334_v3  ;;  %5148 = vmatprep.mubr.msk.f32.mxu0 %vm5335_vm1, %v5334_v3 }
 0x810   : > { %5143 = vmatpush3.msra.mxu0 %v4569_v11  ;;  %5173 = vmatprep.subr.mxu1 %v5334_v3 }
 0x811   : > { %5144 = vmatprep.subr.mxu0 %v5334_v3  ;;  %5175 = vmatprep.mubr.msk.f32.mxu1 %vm5335_vm1, %v5334_v3 }
 0x812   : > { %5145 = vmatpush3.msra.mxu0 %v4568_v12 }
 0x813   : > { %5146 = vmatprep.subr.mxu0 %v5334_v3 }
 0x814   : > { %5147 = vmatpush3.msra.mxu0 %v4567_v13 }
 0x815   : > { %5149 = vmatmul.mubr.msk.f32.vlgmr.msra.gmra.mxu0 %vm269_vm0, %v5858_v38  ;;  %5162 = vmatprep.subr.mxu0 %v5334_v3 }
 0x816   : > { %5163 = vmatpush3.msra.mxu0 %v4578_v14  ;;  %5170 = vmatprep.mubr.msk.f32.mxu0 %vm5335_vm1, %v5334_v3 }
 0x817   : > { %5164 = vmatprep.subr.mxu0 %v5334_v3 }
 0x818   : > { %5165 = vmatpush3.msra.mxu0 %v4577_v15 }
 0x819   : > { %5166 = vmatprep.subr.mxu0 %v5334_v3 }
 0x81a   : > { %5167 = vmatpush3.msra.mxu0 %v4576_v16 }
 0x81b   : > { %5168 = vmatprep.subr.mxu0 %v5334_v3 }
 0x81c   : > { %5169 = vmatpush3.msra.mxu0 %v4575_v20 }
 0x81d   : > { %5171 = vmatmul.mubr.msk.f32.vlgmr.msra.gmra.mxu0 %vm269_vm0, %v5858_v38  ;;  %5183 = vmatprep.subr.mxu0 %v5334_v3 }
 0x81e   : > { %5185 = vmatprep.mubr.msk.f32.mxu0 %vm5335_vm1, %v5334_v3 }
 0x8a6   : > { %v2436_v21 = vpop.f32.mrf.mxu0  ;;  %v2576_v22 = vpop.f32.mrf.mxu1 }
 0x8a8   : > { %v5051_v23 = vpop.f32.mrf.mxu0  ;;  %v5073_v17 = vpop.f32.mrf.mxu1 }
 0x8af   : > { %v2506_v18 = vpop.f32.mrf.mxu0 }
 0x8b0   : > { %v2716_v24 = vpop.f32.mrf.mxu1 }
 0x8b1   : > { %5174 = vmatpush3.xpose.msk.msra.mxu1 %vm1174_vm2, %v2716_v24  ;;  %v5062_v25 = vpop.f32.mrf.mxu0 }
 0x8b2   : > { %v5095_v26 = vpop.f32.mrf.mxu1  ;;  %5178 = vmatprep.subr.mxu1 %v5334_v3 }
 0x8b4   : > { %5176 = vmatmul.mubr.msk.f32.vlgmr.msra.gmra.mxu1 %vm1174_vm2, %v2436_v21 }
 0x8b5   : > { %5180 = vmatprep.mubr.msk.f32.mxu1 %vm5335_vm1, %v5334_v3 }
 0x8b9   : > { %v2646_v30 = vpop.f32.mrf.mxu0 }
 0x8ba   : > { %v2856_v31 = vpop.f32.mrf.mxu1 }
 0x8bb   : > { %5184 = vmatpush3.xpose.msk.msra.mxu0 %vm1174_vm2, %v2856_v31  ;;  %v5084_v32 = vpop.f32.mrf.mxu0 }
 0x8bc   : > { %v5117_v33 = vpop.f32.mrf.mxu1  ;;  %5193 = vmatprep.subr.mxu0 %v5334_v3 }
 0x8be   : > { %5186 = vmatmul.mubr.msk.f32.vlgmr.msra.gmra.mxu0 %vm1174_vm2, %v2576_v22 }
 0x8bf   : > { %5195 = vmatprep.mubr.msk.f32.mxu0 %vm5335_vm1, %v5334_v3 }
 0x8c3   : > { %v2786_v34 = vpop.f32.mrf.mxu0 }
 0x8c4   : > { %v2996_v35 = vpop.f32.mrf.mxu1  ;;  %5179 = vmatpush3.xpose.msk.msra.mxu1 %vm1174_vm2, %v2786_v34 }
 0x8c5   : > { %5194 = vmatpush3.msra.mxu0 %v2996_v35  ;;  %v5106_v36 = vpop.f32.mrf.mxu0  ;;  %5188 = vmatprep.subr.mxu1 %v5334_v3 }
 0x8c6   : > { %v5139_v37 = vpop.f32.mrf.mxu1  ;;  %5203 = vmatprep.subr.mxu0 %v5334_v3  ;;  %v4603_v36 = vld [vmem:[%s6254_s4 + $0x20] sm:$0xff] }
 0x8c7   : > { %5181 = vmatmul.mubr.msk.f32.vlgmr.msra.gmra.mxu1 %vm1174_vm2, %v2506_v18  ;;  %v4604_v37 = vld [vmem:[%s6254_s4 + $0x28] sm:$0xff] }
 0x8c8   : > { %5190 = vmatprep.mubr.msk.f32.mxu1 %vm5335_vm1, %v5334_v3 }
 0x8cd   : > { %v2926_v38 = vpop.f32.mrf.mxu0 }
 0x8ce   : > { %v6084_v39 = vpop.f32.mrf.mxu1  ;;  %5189 = vmatpush3.xpose.msk.msra.mxu1 %vm1174_vm2, %v2926_v38  ;;  %v4605_v38 = vld [vmem:[%s6254_s4 + $0x30] sm:$0xff] }
 0x8cf   : > { %v5128_v42 = vpop.f32.mrf.mxu0  ;;  %5198 = vmatprep.subr.mxu1 %v5334_v3 }
 0x8d0   : > { %v5161_v43 = vpop.f32.mrf.mxu1 }
 0x8d1   : > { %5191 = vmatmul.mubr.msk.f32.vlgmr.msra.gmra.mxu1 %vm1174_vm2, %v2646_v30 }
 0x8d2   : > { %5200 = vmatprep.mubr.msk.f32.mxu1 %vm5335_vm1, %v5334_v3 }
 0x8d5   : > { %v3066_v44 = vpop.f32.mrf.mxu0 }
 0x8d6   : > { %5199 = vmatpush3.msra.mxu1 %v3066_v44 }
 0x8d7   : > { %v5150_v45 = vpop.f32.mrf.mxu0  ;;  %5208 = vmatprep.subr.mxu1 %v5334_v3 }
 0x8d8   : > { %v4606_v45 = vld [vmem:[%s6254_s4 + $0x38] sm:$0xff] }
 0x8dd   : > { %v6092_v46 = vpop.f32.mrf.mxu0 }
 0x8df   : > { %v5172_v47 = vpop.f32.mrf.mxu0 }
 0x974   : > { %v3282_v48 = vpop.f32.mrf.mxu1 }
 0x975   : > { %v3283_v49 = vadd.f32 %v3282_v48, %v5675_v27 }
 0x976   : > { %v5177_v50 = vpop.f32.mrf.mxu1 }
 0x977   : > { %v3514_v51 = vadd.f32 %v3283_v49, %v5682_v29 }
 0x979   : > { %v3518_v52 = vsel %vm1174_vm2, %v3514_v51, -inf }
 0x97a   : > { %3519 = vmax.xlane.f32.xlu1 %v3518_v52 }
 0x97e   : > { %v3434_v53 = vpop.f32.mrf.mxu0 }
 0x97f   : > { %v3435_v54 = vadd.f32 %v3434_v53, %v5693_v40 }
 0x980   : > { %v5187_v55 = vpop.f32.mrf.mxu0 }
 0x981   : > { %v3516_v56 = vadd.f32 %v3435_v54, %v5682_v29 }
 0x983   : > { %v3524_v57 = vsel %vm1174_vm2, %v3516_v56, -inf }
 0x984   : > { %3525 = vmax.xlane.f32.xlu1 %v3524_v57 }
 0x987   : > { %v3358_v58 = vpop.f32.mrf.mxu1 }
 0x988   : > { %v3359_v59 = vadd.f32 %v3358_v58, %v5680_v28 }
 0x989   : > { %v5182_v0 = vpop.f32.mrf.mxu1 }
 0x98a   : > { %v3515_v27 = vadd.f32 %v3359_v59, %v5682_v29 }
 0x98c   : > { %v3521_v60 = vsel %vm1174_vm2, %v3515_v27, -inf }
 0x98d   : > { %3522 = vmax.xlane.f32.xlu0 %v3521_v60 }
 0x991   : > { %v3510_v61 = vpop.f32.mrf.mxu1 }
 0x992   : > { %v3511_v62 = vadd.f32 %v3510_v61, %v5698_v41 }
 0x993   : > { %v5192_v63 = vpop.f32.mrf.mxu1 }
 0x994   : > { %v3517_v40 = vadd.f32 %v3511_v62, %v5682_v29 }
 0x996   : > { %v3527_v1 = vsel %vm1174_vm2, %v3517_v40, -inf }
 0x997   : > { %3528 = vmax.xlane.f32.xlu0 %v3527_v1 }
 0xa03   : > { %v3520_v2 = vpop.xlane.xlu1 %3519 }
 0xa04   : > { %v3530_v4 = vsub.f32 %v3514_v51, %v3520_v2  ;;  %v4176_v2 = vld [vmem:[%s6255_s5 + $0x7c] sm:$0xff] }
 0xa06   : > { %v3534_v5 = vmul.f32 1.442695, %v3530_v4  ;;  %v4175_v4 = vld [vmem:[%s6255_s5 + $0x74] sm:$0xff] }
 0xa08   : > { %5306 = vpow2.f32 %v3534_v5  ;;  %v4174_v5 = vld [vmem:[%s6255_s5 + $0x6c] sm:$0xff] }
 0xa0d   : > { %v3526_v28 = vpop.xlane.xlu1 %3525 }
 0xa0e   : > { %v3532_v6 = vsub.f32 %v3516_v56, %v3526_v28  ;;  %v4258_v28 = vld [vmem:[%s6255_s5 + $0xbc] sm:$0xff] }
 0xa10   : > { %v3538_v7 = vmul.f32 1.442695, %v3532_v6  ;;  %v4257_v6 = vld [vmem:[%s6255_s5 + $0xb4] sm:$0xff] }
 0xa12   : > { %5308 = vpow2.f32 %v3538_v7  ;;  %v4256_v7 = vld [vmem:[%s6255_s5 + $0xac] sm:$0xff] }
 0xa15   : > { %v5307_v8 = vpop.eup %5306 }
 0xa16   : > { %v3523_v9 = vpop.xlane.xlu0 %3522  ;;  %v3542_v10 = vsel %vm1174_vm2, %v5307_v8, 0.0 }
 0xa17   : > { %v3531_v11 = vsub.f32 %v3515_v27, %v3523_v9  ;;  %3543 = vadd.xlane.f32.xlu1 %v3542_v10  ;;  %v4254_v9 = vld [vmem:[%s6255_s5 + $0x9c] sm:$0xff]  ;;  %v4253_v10 = vld [vmem:[%s6255_s5 + $0x94] sm:$0xff] }
 0xa19   : > { %v3536_v41 = vmul.f32 1.442695, %v3531_v11 }
 0xa1b   : > { %5310 = vpow2.f32 %v3536_v41 }
 0xa1f   : > { %v5309_v29 = vpop.eup %5308 }
 0xa20   : > { %v3529_v12 = vpop.xlane.xlu0 %3528  ;;  %v3548_v13 = vsel %vm1174_vm2, %v5309_v29, 0.0 }
 0xa21   : > { %v3533_v14 = vsub.f32 %v3517_v40, %v3529_v12  ;;  %3549 = vadd.xlane.f32.xlu1 %v3548_v13  ;;  %v4611_v13 = vld [vmem:[%s6255_s5 + $0x63] ss:$0 sm:$0xff] }
 0xa23   : > { %v3540_v15 = vmul.f32 1.442695, %v3533_v14 }
 0xa25   : > { %5312 = vpow2.f32 %v3540_v15 }
 0xa28   : > { %v5311_v16 = vpop.eup %5310 }
 0xa29   : > { %v3545_v20 = vsel %vm1174_vm2, %v5311_v16, 0.0 }
 0xa2a   : > { %3546 = vadd.xlane.f32.xlu0 %v3545_v20  ;;  %v4251_v20 = vld [vmem:[%s6255_s5 + $0x84] sm:$0xff] }
 0xa32   : > { %v5313_v21 = vpop.eup %5312 }
 0xa33   : > { %v3551_v22 = vsel %vm1174_vm2, %v5313_v21, 0.0 }
 0xa34   : > { %3552 = vadd.xlane.f32.xlu0 %v3551_v22 }
 0xaa0   : > { %v3544_v23 = vpop.xlane.xlu1 %3543 }
 0xaa1   : > { %5314 = vrcp.f32 %v3544_v23 }
 0xaaa   : > { %v3550_v17 = vpop.xlane.xlu1 %3549 }
 0xaab   : > { %5316 = vrcp.f32 %v3550_v17 }
 0xaae   : > { %v5315_v18 = vpop.eup %5314 }
 0xaaf   : > { %v3555_v24 = vmul.f32 %v5315_v18, %v5307_v8  ;;  %v4255_v8 = vld [vmem:[%s6255_s5 + $0xa4] sm:$0xff] }
 0xab1   : > { %5196 = vmatmul.mubr.msk.f32.vlgmr.msra.gmra.mxu0 %vm1174_vm2, %v3555_v24 }
 0xab2   : > { %5204 = vmatpush3.msra.mxu0 %v6084_v39  ;;  %5205 = vmatprep.mubr.msk.f32.mxu0 %vm5335_vm1, %v5334_v3 }
 0xab3   : > { %v3547_v25 = vpop.xlane.xlu0 %3546  ;;  %5213 = vmatprep.subr.mxu0 %v5334_v3 }
 0xab4   : > { %5318 = vrcp.f32 %v3547_v25 }
 0xab8   : > { %v5317_v26 = vpop.eup %5316 }
 0xab9   : > { %v3559_v30 = vmul.f32 %v5317_v26, %v5309_v29 }
 0xabb   : > { %5206 = vmatmul.mubr.msk.f32.vlgmr.msra.gmra.mxu0 %vm1174_vm2, %v3559_v30  ;;  %v4350_v30 = vld [vmem:[%s6255_s5 + $0xdd] sm:$0xff] }
 0xabc   : > { %5215 = vmatprep.mubr.msk.f32.mxu0 %vm5335_vm1, %v5334_v3  ;;  %5214 = vmatpush3.msra.mxu0 %v4603_v36 }
 0xabd   : > { %v3553_v31 = vpop.xlane.xlu0 %3552  ;;  %5223 = vmatprep.subr.mxu0 %v5334_v3 }
 0xabe   : > { %5320 = vrcp.f32 %v3553_v31  ;;  %v4349_v31 = vld [vmem:[%s6255_s5 + $0xd5] sm:$0xff] }
 0xac1   : > { %v5319_v32 = vpop.eup %5318 }
 0xac2   : > { %v3557_v33 = vmul.f32 %v5319_v32, %v5311_v16  ;;  %v4252_v16 = vld [vmem:[%s6255_s5 + $0x8c] sm:$0xff] }
 0xac3   : > { %v4348_v32 = vld [vmem:[%s6255_s5 + $0xcd] sm:$0xff] }
 0xac4   : > { %5201 = vmatmul.mubr.msk.f32.vlgmr.msra.gmra.mxu1 %vm1174_vm2, %v3557_v33  ;;  %v4347_v33 = vld [vmem:[%s6255_s5 + $0xc5] sm:$0xff] }
 0xac5   : > { %5209 = vmatpush3.msra.mxu1 %v6092_v46  ;;  %5210 = vmatprep.mubr.msk.f32.mxu1 %vm5335_vm1, %v5334_v3 }
 0xac6   : > { %5218 = vmatprep.subr.mxu1 %v5334_v3 }
 0xacb   : > { %v5321_v34 = vpop.eup %5320 }
 0xacc   : > { %v3561_v35 = vmul.f32 %v5321_v34, %v5313_v21 }
 0xace   : > { %5211 = vmatmul.mubr.msk.f32.vlgmr.msra.gmra.mxu1 %vm1174_vm2, %v3561_v35 }
 0xacf   : > { %5220 = vmatprep.mubr.msk.f32.mxu1 %vm5335_vm1, %v5334_v3  ;;  %5219 = vmatpush3.msra.mxu1 %v4604_v37 }
 0xad0   : > { %5228 = vmatprep.subr.mxu1 %v5334_v3 }
 0xb71   : > { %v3631_v39 = vpop.f32.mrf.mxu0 }
 0xb72   : > { %5216 = vmatmul.mubr.msk.f32.vlgmr.msra.gmra.mxu0 %vm1174_vm2, %v3631_v39 }
 0xb73   : > { %v5197_v42 = vpop.f32.mrf.mxu0  ;;  %5224 = vmatpush3.msra.mxu0 %v4605_v38  ;;  %5225 = vmatprep.mubr.msk.f32.mxu0 %vm5335_vm1, %v5334_v3  ;;  %v4614_v38 = vld [vmem:[%s6255_s5 + $0xc4] ss:$0 sm:$0xff] }
 0xb74   : > { %5233 = vmatprep.subr.mxu0 %v5334_v3 }
 0xb7b   : > { %v3777_v43 = vpop.f32.mrf.mxu0 }
 0xb7c   : > { %5226 = vmatmul.mubr.msk.f32.vlgmr.msra.gmra.mxu0 %vm1174_vm2, %v3777_v43  ;;  %v4351_v43 = vld [vmem:[%s6255_s5 + $0xe5] sm:$0x1] }
 0xb7d   : > { %v5207_v44 = vpop.f32.mrf.mxu0  ;;  %5241 = vmatprep.mubr.msk.f32.mxu0 %vm5335_vm1, %v5334_v3  ;;  %5234 = vmatpush3.msra.mxu0 %v4176_v2 }
 0xb7e   : > { %5235 = vmatprep.subr.mxu0 %v5334_v3 }
 0xb7f   : > { %5236 = vmatpush3.msra.mxu0 %v4175_v4 }
 0xb80   : > { %5237 = vmatprep.subr.mxu0 %v5334_v3 }
 0xb81   : > { %5238 = vmatpush3.msra.mxu0 %v4174_v5 }
 0xb82   : > { %5239 = vmatprep.subr.mxu0 %v5334_v3 }
 0xb84   : > { %v3704_v46 = vpop.f32.mrf.mxu1 }
 0xb85   : > { %5221 = vmatmul.mubr.msk.f32.vlgmr.msra.gmra.mxu1 %vm1174_vm2, %v3704_v46  ;;  %v4426_v46 = vld [vmem:[%s6255_s5 + $0xe6] sm:$0x1] }
 0xb86   : > { %v5202_v47 = vpop.f32.mrf.mxu1  ;;  %5229 = vmatpush3.msra.mxu1 %v4606_v45  ;;  %5230 = vmatprep.mubr.msk.f32.mxu1 %vm5335_vm1, %v5334_v3 }
 0xb87   : > { %5244 = vmatprep.subr.mxu1 %v5334_v3 }
 0xb8e   : > { %v3850_v48 = vpop.f32.mrf.mxu1 }
 0xb8f   : > { %5231 = vmatmul.mubr.msk.f32.vlgmr.msra.gmra.mxu1 %vm1174_vm2, %v3850_v48 }
 0xb90   : > { %v5212_v49 = vpop.f32.mrf.mxu1  ;;  %5260 = vmatprep.mubr.msk.f32.mxu1 %vm5335_vm1, %v5334_v3  ;;  %5245 = vmatpush3.msra.mxu1 %v4258_v28 }
 0xb91   : > { %5246 = vmatprep.subr.mxu1 %v5334_v3 }
 0xb92   : > { %5247 = vmatpush3.msra.mxu1 %v4257_v6 }
 0xb93   : > { %5248 = vmatprep.subr.mxu1 %v5334_v3 }
 0xb94   : > { %5249 = vmatpush3.msra.mxu1 %v4256_v7 }
 0xb95   : > { %5250 = vmatprep.subr.mxu1 %v5334_v3 }
 0xb96   : > { %5251 = vmatpush3.msra.mxu1 %v4255_v8 }
 0xb97   : > { %5252 = vmatprep.subr.mxu1 %v5334_v3 }
 0xb98   : > { %5253 = vmatpush3.msra.mxu1 %v4254_v9 }
 0xb99   : > { %5254 = vmatprep.subr.mxu1 %v5334_v3 }
 0xb9a   : > { %5255 = vmatpush3.msra.mxu1 %v4253_v10 }
 0xb9b   : > { %5256 = vmatprep.subr.mxu1 %v5334_v3 }
 0xb9c   : > { %5257 = vmatpush3.msra.mxu1 %v4252_v16 }
 0xb9d   : > { %5258 = vmatprep.subr.mxu1 %v5334_v3 }
 0xb9e   : > { %5259 = vmatpush3.msra.mxu1 %v4251_v20 }
 0xc32   : > { %v3928_v50 = vpop.f32.mrf.mxu0 }
 0xc33   : > { %v4151_v57 = vsel %vm269_vm0, %v3928_v50, 0.0  ;;  %v4432_v50 = vld [vmem:[%s6255_s5 + $0xe7] sm:$0x1] }
 0xc34   : > { %v5217_v51 = vpop.f32.mrf.mxu0 }
 0xc3c   : > { %v4074_v52 = vpop.f32.mrf.mxu0 }
 0xc3d   : > { %v4154_v59 = vsel %vm269_vm0, %v4074_v52, 0.0 }
 0xc3e   : > { %v5227_v53 = vpop.f32.mrf.mxu0 }
 0xc45   : > { %v4001_v54 = vpop.f32.mrf.mxu1 }
 0xc46   : > { %v4152_v56 = vsel %vm269_vm0, %v4001_v54, 0.0 }
 0xc47   : > { %v5222_v55 = vpop.f32.mrf.mxu1  ;;  %v4153_v58 = vadd.f32 %v4152_v56, %v4151_v57 }
 0xc49   : > { %v4155_v27 = vadd.f32 %v4154_v59, %v4153_v58 }
 0xc4f   : > { %v4147_v0 = vpop.f32.mrf.mxu1 }
 0xc50   : > { %v4156_v60 = vsel %vm269_vm0, %v4147_v0, 0.0 }
 0xc51   : > { %v4157_v61 = vadd.f32 %v4156_v60, %v4155_v27  ;;  %v5232_v62 = vpop.f32.mrf.mxu1 }
 0xc53   : > { %v4158_v63 = vadd.f32 %v4157_v61, %v5817_v19  ;;  %v4173_v19 = vld [vmem:[%s6255_s5 + $0x64] sm:$0xff] }
 0xc54   : > { %5240 = vmatpush3.msra.mxu0 %v4173_v19 }
 0xc55   : > { %v4160_v40 = vmul.f32 %v4158_v63, %v4158_v63  ;;  %5263 = vmatprep.subr.mxu0 %v5334_v3 }
 0xc57   : > { %v4161_v1 = vsel %vm269_vm0, %v4160_v40, 0.0 }
 0xc58   : > { %4162 = vadd.xlane.f32.xlu1 %v4161_v1 }
 0xce1   : > { %v4163_v11 = vpop.xlane.xlu1 %4162 }
 0xce2   : > { %v4164_v41 = vmul.f32 0.03125, %v4163_v11 }
 0xce4   : > { %v4165_v29 = vadd.f32 1e-06, %v4164_v41 }
 0xce6   : > { %5322 = vrsqrt.f32 %v4165_v29 }
 0xcf3   : > { %v5323_v12 = vpop.eup %5322 }
 0xcf4   : > { %v4167_v14 = vmul.f32 %v5323_v12, %v4158_v63 }
 0xcf6   : > { %v4172_v15 = vmul.f32 %v4611_v13, %v4167_v14 }
 0xcf8   : > { %5242 = vmatmul.mubr.msk.f32.vlgmr.msra.gmra.mxu0 %vm269_vm0, %v4172_v15 }
 0xcf9   : > { %5271 = vmatprep.mubr.msk.f32.mxu0 %vm5335_vm1, %v5334_v3  ;;  %5264 = vmatpush3.msra.mxu0 %v4350_v30 }
 0xcfa   : > { %5265 = vmatprep.subr.mxu0 %v5334_v3 }
 0xcfb   : > { %5266 = vmatpush3.msra.mxu0 %v4349_v31 }
 0xcfc   : > { %5267 = vmatprep.subr.mxu0 %v5334_v3 }
 0xcfd   : > { %5268 = vmatpush3.msra.mxu0 %v4348_v32 }
 0xcfe   : > { %5269 = vmatprep.subr.mxu0 %v5334_v3 }
 0xcff   : > { %5270 = vmatpush3.msra.mxu0 %v4347_v33 }
 0xdb8   : > { %v4246_v21 = vpop.f32.mrf.mxu0 }
 0xdb9   : > { %v4250_v22 = vmax.f32 %v4246_v21, 0.0 }
 0xdba   : > { %v5243_v23 = vpop.f32.mrf.mxu0 }
 0xdbb   : > { %5261 = vmatmul.mubr.msk.f32.vlgmr.msra.gmra.mxu1 %vm2229_vm3, %v4250_v22 }
 0xe7b   : > { %v4328_v17 = vpop.f32.mrf.mxu1 }
 0xe7c   : > { %v4332_v18 = vadd.f32 %v4328_v17, %v4158_v63 }
 0xe7d   : > { %v5262_v24 = vpop.f32.mrf.mxu1 }
 0xe7e   : > { %v4334_v25 = vmul.f32 %v4332_v18, %v4332_v18 }
 0xe80   : > { %v4335_v26 = vsel %vm269_vm0, %v4334_v25, 0.0 }
 0xe81   : > { %4336 = vadd.xlane.f32.xlu0 %v4335_v26 }
 0xf0a   : > { %v4337_v34 = vpop.xlane.xlu0 %4336 }
 0xf0b   : > { %v4338_v35 = vmul.f32 0.03125, %v4337_v34 }
 0xf0d   : > { %v4339_v36 = vadd.f32 1e-06, %v4338_v35 }
 0xf0f   : > { %5324 = vrsqrt.f32 %v4339_v36 }
 0xf1c   : > { %v5325_v37 = vpop.eup %5324 }
 0xf1d   : > { %v4341_v39 = vmul.f32 %v5325_v37, %v4332_v18 }
 0xf1f   : > { %v4346_v42 = vmul.f32 %v4614_v38, %v4341_v39 }
 0xf21   : > { %5272 = vmatmul.mubr.msk.f32.vlgmr.msra.gmra.mxu0 %vm269_vm0, %v4346_v42 }
 0xfe1   : > { %v4421_v3 = vpop.f32.mrf.mxu0 }
 0xfe2   : > { %v4422_v44 = vadd.f32 %v4421_v3, %v4351_v43 }
 0xfe3   : > { %v5273_v45 = vpop.f32.mrf.mxu0 }
 0xfe4   : > { %v4425_v47 = vmax.f32 %v4422_v44, 0.0 }
 0xfe6   : > { %v4427_v48 = vmul.f32 %v4426_v46, %v4425_v47 }
 0xfe8   : > { %v4429_v49 = vsel %vm4428_vm4, %v4427_v48, 0.0 }
 0xfe9   : > { %4430 = vadd.xlane.f32.xlu1 %v4429_v49 }
0x1072   : > { %v4431_v51 = vpop.xlane.xlu1 %4430 }
0x1073   : > { %v4433_v52 = vadd.f32 %v4432_v50, %v4431_v51 }
0x1075   : > { %4435 = vst.msk [vmem:[%s258_s10] sm:$0x1] %vm4434_vm5, %v4433_v52 }
0x1076 PF: > { %s16_s21 = sadd.s32 1, %s5332_s21  }
0x1077   : > { %p13_p4 = scmp.ge.s32.totalorder %s16_s21, 4  }
0x1079   :  { %15 = sbr.rel (!%p13_p4) target bundleno = 1 (0x1), region = 79 }

</bundles_post_ra>
